<compile_context>
chip_gen: v7x
topology: tpu7x:2x2x1
jax: 0.10.0
libtpu: 0.0.40
codegen_flags: <defaults>
</compile_context>

<pallas_src>
import jax
import jax.numpy as jnp
from jax import lax
from jax.experimental import pallas as pl
from jax.experimental.pallas import tpu as pltpu


def _make_birnn_kernel(seq, bpad):
    """Kernel factory; seq and padded batch are compile-time constants."""

    def kernel(idx_ref,          # (seq*bpad, 1)    int32 token ids
               emb_ref,          # (V, H)           bf16 embedding table
               wih_ref,          # (H, 8H)          bf16 fused fwd+bwd input projection
               whh_ref,          # (2H, 8H)         bf16 block-diagonal recurrent weight
               b_ref,            # (1, 8H)          f32 fused gate bias (= b_ih + b_hh)
               wfc_ref,          # (2H, OUTP)       bf16 FC weight
               bfc_ref,          # (1, OUTP)        f32 FC bias
               out_ref,          # (seq*bpad, OUTP) f32
               gx_ref,           # scratch (seq*bpad, 8H) f32 : hoisted x @ Wih_all
               h_ref):           # scratch (seq*bpad, 2H) f32 : [h_f(t) | h_b(t)]
        sbp = idx_ref.shape[0]
        vocab, hidden = emb_ref.shape
        h2 = 2 * hidden
        h8 = 8 * hidden

        # ---- fused embedding gather: one-hot @ table (exact, MXU-friendly) ----
        iota = lax.broadcasted_iota(jnp.int32, (sbp, vocab), 1)
        onehot = (idx_ref[...] == iota).astype(jnp.bfloat16)
        x = jnp.dot(onehot, emb_ref[...],
                    preferred_element_type=jnp.float32).astype(jnp.bfloat16)   # (sbp, H)

        # ---- hoisted input projection: ONE (sbp,H)@(H,8H) matmul for both dirs ----
        gx_ref[...] = jnp.dot(x, wih_ref[...], preferred_element_type=jnp.float32)

        # ---- constants hoisted out of the recurrence (no per-iteration broadcasts) ----
        bias = jnp.broadcast_to(b_ref[...], (bpad, h8))                  # (bpad, 8H) f32
        lane = lax.broadcasted_iota(jnp.int32, (bpad, h8), 1)
        fwd_lane = (lane % h2) < hidden      # fwd sub-block of every interleaved gate

        z_h = jnp.zeros((bpad, h2), jnp.bfloat16)
        z_c = jnp.zeros((bpad, h2), jnp.float32)

        def step(t, carry):
            # carry holds two independent chains: h = [h_f(t-1) | h_b(seq-t)], c likewise.
            h, c = carry
            rf = pl.multiple_of(t * bpad, bpad)               # fwd consumes time t
            rb = pl.multiple_of((seq - 1 - t) * bpad, bpad)   # bwd consumes time seq-1-t
            gx_f = gx_ref[pl.ds(rf, bpad), :]
            gx_b = gx_ref[pl.ds(rb, bpad), :]
            # fwd gate columns come from the row of time t, bwd columns from seq-1-t.
            gates = (jnp.where(fwd_lane, gx_f, gx_b) + bias
                     + jnp.dot(h, whh_ref[...], preferred_element_type=jnp.float32))
            # Interleaved layout: [ i_f|i_b | f_f|f_b | g_f|g_b | o_f|o_b ]
            sig = jax.nn.sigmoid(gates)            # one EUP pass over the full 8H lanes
            i_g = sig[:, 0 * h2:1 * h2]
            f_g = sig[:, 1 * h2:2 * h2]
            o_g = sig[:, 3 * h2:4 * h2]
            g_g = jnp.tanh(gates[:, 2 * h2:3 * h2])
            c_new = f_g * c + i_g * g_g
            h_new = o_g * jnp.tanh(c_new)
            # Store each direction at the time position it just produced.
            h_ref[pl.ds(rf, bpad), :hidden] = h_new[:, :hidden]      # h_f(t)
            h_ref[pl.ds(rb, bpad), hidden:] = h_new[:, hidden:]      # h_b(seq-1-t)
            return (h_new.astype(jnp.bfloat16), c_new)

        lax.fori_loop(0, seq, step, (z_h, z_c), unroll=min(seq, 8))

        # ---- fused FC: ONE (sbp,2H)@(2H,OUTP) matmul, lane-dense output store ----
        out_ref[...] = (jnp.dot(h_ref[...].astype(jnp.bfloat16), wfc_ref[...],
                                preferred_element_type=jnp.float32)
                        + bfc_ref[...])

    return kernel


def _interleave_gates(wf, wb, hidden):
    """(..., 4H) fwd + (..., 4H) bwd -> (..., 8H) = [i_f|i_b | f_f|f_b | g_f|g_b | o_f|o_b]."""
    parts = []
    for k in range(4):
        parts.append(wf[..., k * hidden:(k + 1) * hidden])
        parts.append(wb[..., k * hidden:(k + 1) * hidden])
    return jnp.concatenate(parts, axis=-1)


def birnn_forward(idx, params):
    """idx: (seq, 1, batch) int32 token indices -> (seq, batch, out) float32."""
    x = jnp.squeeze(idx, axis=1)                       # (seq, batch)
    seq, batch = x.shape
    vocab, hidden = params["embedding"].shape
    out_size = params["b_fc"].shape[-1]

    bpad = ((batch + 7) // 8) * 8                      # sublane-dense batch
    outp = ((out_size + 127) // 128) * 128             # lane-dense FC output

    # Pad batch with token 0 (padded rows are per-row independent garbage, sliced away).
    idx_p = jnp.zeros((seq, bpad), jnp.int32).at[:, :batch].set(x)
    idx_flat = idx_p.reshape(seq * bpad, 1)

    bf16 = jnp.bfloat16
    emb = params["embedding"].astype(bf16)

    # Fused input-projection weight / bias for both directions, gate-interleaved columns.
    wih_all = _interleave_gates(params["w_ih_f"], params["w_ih_b"], hidden).astype(bf16)
    b_all = _interleave_gates(params["b_f"], params["b_b"], hidden)          # (1, 8H) f32

    # Block-diagonal recurrent weight (2H, 8H): rows 0:H (h_f) feed only the fwd gate
    # columns, rows H:2H (h_b) only the bwd gate columns -> one MXU push per step.
    zeros_hh = jnp.zeros_like(params["w_hh_f"])
    whh_all = jnp.concatenate(
        [_interleave_gates(params["w_hh_f"], zeros_hh, hidden),
         _interleave_gates(zeros_hh, params["w_hh_b"], hidden)], axis=0).astype(bf16)

    # FC weight already ordered [fwd rows | bwd rows]; pad the output dim to 128 lanes.
    wfc_p = jnp.zeros((2 * hidden, outp), jnp.float32).at[:, :out_size].set(
        params["w_fc"]).astype(bf16)
    bfc_p = jnp.zeros((1, outp), jnp.float32).at[:, :out_size].set(params["b_fc"])

    kernel = _make_birnn_kernel(seq, bpad)
    sbp = seq * bpad

    # Explicit scoped-VMEM budget: io + scratch with 2x headroom, clamped to chip limits.
    def nbytes(shape, dt):
        n = 1
        for s in shape:
            n *= int(s)
        return n * jnp.dtype(dt).itemsize

    need = (nbytes((sbp, 1), jnp.int32) + nbytes(emb.shape, bf16)
            + nbytes(wih_all.shape, bf16) + nbytes(whh_all.shape, bf16)
            + nbytes(b_all.shape, jnp.float32)
            + nbytes(wfc_p.shape, bf16) + nbytes(bfc_p.shape, jnp.float32)
            + nbytes((sbp, outp), jnp.float32)
            + nbytes((sbp, 8 * hidden), jnp.float32)
            + nbytes((sbp, 2 * hidden), jnp.float32))
    vmem_limit = int(min(64 << 20, max(32 << 20, 2 * need)))

    out_flat = pl.pallas_call(
        kernel,
        out_shape=jax.ShapeDtypeStruct((sbp, outp), jnp.float32),
        scratch_shapes=[
            pltpu.VMEM((sbp, 8 * hidden), jnp.float32),   # gx: hoisted x @ Wih_all
            pltpu.VMEM((sbp, 2 * hidden), jnp.float32),   # h history: [h_f(t) | h_b(t)]
        ],
        compiler_params=pltpu.CompilerParams(vmem_limit_bytes=vmem_limit),
    )(idx_flat, emb, wih_all, whh_all, b_all, wfc_p, bfc_p)

    return out_flat.reshape(seq, bpad, outp)[:, :batch, :out_size]


def birnn_reference(idx, params):
    """Pure-JAX f32 reference mirroring the PyTorch forward pass."""
    x = jnp.squeeze(idx, axis=1)
    emb = jnp.take(params["embedding"], x, axis=0)     # (seq, batch, H)
    seq, batch, hidden = emb.shape

    def cell(x_t, h, c, wih, whh, b):
        gates = x_t @ wih + h @ whh + b
        i = jax.nn.sigmoid(gates[:, 0 * hidden:1 * hidden])
        f = jax.nn.sigmoid(gates[:, 1 * hidden:2 * hidden])
        g = jnp.tanh(gates[:, 2 * hidden:3 * hidden])
        o = jax.nn.sigmoid(gates[:, 3 * hidden:4 * hidden])
        c = f * c + i * g
        h = o * jnp.tanh(c)
        return h, c

    h = jnp.zeros((batch, hidden)); c = jnp.zeros((batch, hidden))
    hf = []
    for t in range(seq):
        h, c = cell(emb[t], h, c, params["w_ih_f"], params["w_hh_f"], params["b_f"])
        hf.append(h)
    h = jnp.zeros((batch, hidden)); c = jnp.zeros((batch, hidden))
    hb = [None] * seq
    for t in range(seq - 1, -1, -1):
        h, c = cell(emb[t], h, c, params["w_ih_b"], params["w_hh_b"], params["b_b"])
        hb[t] = h
    lstm_out = jnp.stack([jnp.concatenate([hf[t], hb[t]], axis=-1) for t in range(seq)])
    return lstm_out @ params["w_fc"] + params["b_fc"]


def init_params(key, vocab_size, hidden_size, output_size):
    ks = jax.random.split(key, 9)
    u = lambda k, shape: jax.random.uniform(k, shape, jnp.float32, -0.1, 0.1)
    return {
        "embedding": u(ks[0], (vocab_size, hidden_size)),
        # stored pre-transposed: (in, 4H) so kernel does x @ W, gate order [i|f|g|o]
        "w_ih_f": u(ks[1], (hidden_size, 4 * hidden_size)),
        "w_hh_f": u(ks[2], (hidden_size, 4 * hidden_size)),
        "b_f":    u(ks[3], (1, 4 * hidden_size)),   # = b_ih + b_hh (combined)
        "w_ih_b": u(ks[4], (hidden_size, 4 * hidden_size)),
        "w_hh_b": u(ks[5], (hidden_size, 4 * hidden_size)),
        "b_b":    u(ks[6], (1, 4 * hidden_size)),
        "w_fc":   u(ks[7], (2 * hidden_size, output_size)),
        "b_fc":   u(ks[8], (1, output_size)),
    }


if __name__ == "__main__":
    vocab_size, hidden_size, output_size = 16, 32, 8
    seq_len, batch = 8, 2

    key = jax.random.PRNGKey(0)
    k_param, k_idx = jax.random.split(key)
    params = init_params(k_param, vocab_size, hidden_size, output_size)

    idx = jax.random.randint(k_idx, (seq_len, 1, batch), 0, vocab_size, jnp.int32)

    out = jax.block_until_ready(birnn_forward(idx, params))
    ref = birnn_reference(idx, params)

    assert out.shape == (seq_len, batch, output_size)
    assert bool(jnp.all(jnp.isfinite(out)))
    # bf16 MXU operands with f32 accumulation -> slightly looser tolerance.
    assert bool(jnp.allclose(out, ref, rtol=2e-2, atol=2e-2)), \
        float(jnp.max(jnp.abs(out - ref)))

    print("KERNEL_OK")
</pallas_src>

<mosaic_0001>
module attributes {stable_mosaic.version = 11 : i64} {
  func.func @kernel(%arg0: memref<64x1xi32, #tpu.memory_space<vmem>>, %arg1: memref<16x32xbf16, #tpu.memory_space<vmem>>, %arg2: memref<32x256xbf16, #tpu.memory_space<vmem>>, %arg3: memref<64x256xbf16, #tpu.memory_space<vmem>>, %arg4: memref<1x256xf32, #tpu.memory_space<vmem>>, %arg5: memref<64x128xbf16, #tpu.memory_space<vmem>>, %arg6: memref<1x128xf32, #tpu.memory_space<vmem>>, %arg7: memref<64x128xf32, #tpu.memory_space<vmem>>, %arg8: memref<64x256xf32, #tpu.memory_space<vmem>>, %arg9: memref<64x64xf32, #tpu.memory_space<vmem>>) attributes {dimension_semantics = [], scalar_prefetch = 0 : i64, scratch_operands = 2 : i64, tpu.core_type = #tpu.core_type<tc>} {
    %0 = tpu.iota {dimensions = array<i32: 1>} : vector<64x16xi32>
    %c0 = arith.constant 0 : index
    %c0_0 = arith.constant 0 : index
    %1 = vector.load %arg0[%c0, %c0_0] : memref<64x1xi32, #tpu.memory_space<vmem>>, vector<64x1xi32>
    %2 = vector.broadcast %1 : vector<64x1xi32> to vector<64x16xi32>
    %3 = arith.cmpi eq, %2, %0 : vector<64x16xi32>
    %4 = arith.extui %3 : vector<64x16xi1> to vector<64x16xi32>
    %5 = arith.sitofp %4 : vector<64x16xi32> to vector<64x16xf32>
    %6 = arith.truncf %5 : vector<64x16xf32> to vector<64x16xbf16>
    %c0_1 = arith.constant 0 : index
    %c0_2 = arith.constant 0 : index
    %7 = vector.load %arg1[%c0_1, %c0_2] : memref<16x32xbf16, #tpu.memory_space<vmem>>, vector<16x32xbf16>
    %cst = arith.constant dense<0.000000e+00> : vector<64x32xf32>
    %8 = tpu.matmul %6, %7, %cst {dimension_numbers = #tpu.dot_dimension_numbers<[1], [0], [0], [1], [0, 0, 1, 1], [], []>} : vector<64x16xbf16>, vector<16x32xbf16>, vector<64x32xf32> -> vector<64x32xf32>
    %9 = arith.truncf %8 : vector<64x32xf32> to vector<64x32xbf16>
    %c0_3 = arith.constant 0 : index
    %c0_4 = arith.constant 0 : index
    %10 = vector.load %arg2[%c0_3, %c0_4] : memref<32x256xbf16, #tpu.memory_space<vmem>>, vector<32x256xbf16>
    %cst_5 = arith.constant dense<0.000000e+00> : vector<64x256xf32>
    %11 = tpu.matmul %9, %10, %cst_5 {dimension_numbers = #tpu.dot_dimension_numbers<[1], [0], [0], [1], [0, 0, 1, 1], [], []>} : vector<64x32xbf16>, vector<32x256xbf16>, vector<64x256xf32> -> vector<64x256xf32>
    %c0_6 = arith.constant 0 : index
    %c0_7 = arith.constant 0 : index
    %12 = vector.load %arg8[%c0_6, %c0_7] : memref<64x256xf32, #tpu.memory_space<vmem>>, vector<64x256xf32>
    tpu.vector_store %arg8[%c0_6, %c0_7], %11 {strides = array<i32>} : memref<64x256xf32, #tpu.memory_space<vmem>>, vector<64x256xf32>,
    %c0_8 = arith.constant 0 : index
    %c0_9 = arith.constant 0 : index
    %13 = vector.load %arg4[%c0_8, %c0_9] : memref<1x256xf32, #tpu.memory_space<vmem>>, vector<1x256xf32>
    %14 = vector.shape_cast %13 : vector<1x256xf32> to vector<1x256xf32>
    %15 = vector.broadcast %14 : vector<1x256xf32> to vector<8x256xf32>
    %16 = tpu.iota {dimensions = array<i32: 1>} : vector<8x256xi32>
    %c64_i32 = arith.constant 64 : i32
    %c0_i32 = arith.constant 0 : i32
    %17 = arith.cmpi eq, %c64_i32, %c0_i32 : i32
    %c1_i32 = arith.constant 1 : i32
    %18 = arith.select %17, %c1_i32, %c64_i32 : i32
    %19 = vector.broadcast %18 : i32 to vector<8x256xi32>
    %20 = arith.remsi %16, %19 : vector<8x256xi32>
    %c0_i32_10 = arith.constant 0 : i32
    %21 = vector.broadcast %c0_i32_10 : i32 to vector<8x256xi32>
    %22 = arith.cmpi ne, %20, %21 : vector<8x256xi32>
    %c0_i32_11 = arith.constant 0 : i32
    %23 = vector.broadcast %c0_i32_11 : i32 to vector<8x256xi32>
    %24 = arith.cmpi slt, %20, %23 : vector<8x256xi32>
    %c0_i32_12 = arith.constant 0 : i32
    %25 = arith.cmpi slt, %18, %c0_i32_12 : i32
    %26 = vector.broadcast %25 : i1 to vector<8x256xi1>
    %27 = vector.broadcast %26 : vector<8x256xi1> to vector<8x256xi1>
    %28 = arith.xori %24, %27 : vector<8x256xi1>
    %29 = arith.andi %28, %22 : vector<8x256xi1>
    %30 = vector.broadcast %18 : i32 to vector<8x256xi32>
    %31 = arith.addi %20, %30 : vector<8x256xi32>
    %32 = arith.select %29, %31, %20 : vector<8x256xi1>, vector<8x256xi32>
    %c32_i32 = arith.constant 32 : i32
    %33 = vector.broadcast %c32_i32 : i32 to vector<8x256xi32>
    %34 = arith.cmpi slt, %32, %33 : vector<8x256xi32>
    %cst_13 = arith.constant 0.000000e+00 : bf16
    %35 = vector.broadcast %cst_13 : bf16 to vector<8x64xbf16>
    %cst_14 = arith.constant 0.000000e+00 : f32
    %36 = vector.broadcast %cst_14 : f32 to vector<8x64xf32>
    %c0_i32_15 = arith.constant 0 : i32
    %c8_i32 = arith.constant 8 : i32
    %37 = arith.muli %c0_i32_15, %c8_i32 : i32
    %38 = tpu.assume_multiple %37, 8 : i32
    %c7_i32 = arith.constant 7 : i32
    %39 = arith.subi %c7_i32, %c0_i32_15 : i32
    %c8_i32_16 = arith.constant 8 : i32
    %40 = arith.muli %39, %c8_i32_16 : i32
    %41 = tpu.assume_multiple %40, 8 : i32
    %42 = arith.index_cast %38 : i32 to index
    %c0_17 = arith.constant 0 : index
    %43 = vector.load %arg8[%42, %c0_17] : memref<64x256xf32, #tpu.memory_space<vmem>>, vector<8x256xf32>
    %44 = arith.index_cast %41 : i32 to index
    %c0_18 = arith.constant 0 : index
    %45 = vector.load %arg8[%44, %c0_18] : memref<64x256xf32, #tpu.memory_space<vmem>>, vector<8x256xf32>
    %46 = arith.select %34, %43, %45 : vector<8x256xi1>, vector<8x256xf32>
    %47 = arith.addf %46, %15 : vector<8x256xf32>
    %c0_19 = arith.constant 0 : index
    %c0_20 = arith.constant 0 : index
    %48 = vector.load %arg3[%c0_19, %c0_20] : memref<64x256xbf16, #tpu.memory_space<vmem>>, vector<64x256xbf16>
    %cst_21 = arith.constant dense<0.000000e+00> : vector<8x256xf32>
    %49 = tpu.matmul %35, %48, %cst_21 {dimension_numbers = #tpu.dot_dimension_numbers<[1], [0], [0], [1], [0, 0, 1, 1], [], []>} : vector<8x64xbf16>, vector<64x256xbf16>, vector<8x256xf32> -> vector<8x256xf32>
    %50 = arith.addf %47, %49 : vector<8x256xf32>
    %51 = arith.negf %50 : vector<8x256xf32>
    %52 = math.exp %51 : vector<8x256xf32>
    %cst_22 = arith.constant 1.000000e+00 : f32
    %53 = vector.broadcast %cst_22 : f32 to vector<8x256xf32>
    %54 = arith.addf %53, %52 : vector<8x256xf32>
    %55 = arith.divf %53, %54 : vector<8x256xf32>
    %56 = vector.extract_strided_slice %55 {offsets = [0, 0], sizes = [8, 64], strides = [1, 1]} : vector<8x256xf32> to vector<8x64xf32>
    %57 = vector.extract_strided_slice %55 {offsets = [0, 64], sizes = [8, 64], strides = [1, 1]} : vector<8x256xf32> to vector<8x64xf32>
    %58 = vector.extract_strided_slice %55 {offsets = [0, 192], sizes = [8, 64], strides = [1, 1]} : vector<8x256xf32> to vector<8x64xf32>
    %59 = vector.extract_strided_slice %50 {offsets = [0, 128], sizes = [8, 64], strides = [1, 1]} : vector<8x256xf32> to vector<8x64xf32>
    %60 = math.tanh %59 : vector<8x64xf32>
    %61 = arith.mulf %57, %36 : vector<8x64xf32>
    %62 = arith.mulf %56, %60 : vector<8x64xf32>
    %63 = arith.addf %61, %62 : vector<8x64xf32>
    %64 = math.tanh %63 : vector<8x64xf32>
    %65 = arith.mulf %58, %64 : vector<8x64xf32>
    %66 = vector.extract_strided_slice %65 {offsets = [0, 0], sizes = [8, 32], strides = [1, 1]} : vector<8x64xf32> to vector<8x32xf32>
    %67 = arith.index_cast %38 : i32 to index
    %c0_23 = arith.constant 0 : index
    %68 = vector.load %arg9[%67, %c0_23] : memref<64x64xf32, #tpu.memory_space<vmem>>, vector<8x32xf32>
    tpu.vector_store %arg9[%67, %c0_23], %66 {strides = array<i32>} : memref<64x64xf32, #tpu.memory_space<vmem>>, vector<8x32xf32>,
    %69 = vector.extract_strided_slice %65 {offsets = [0, 32], sizes = [8, 32], strides = [1, 1]} : vector<8x64xf32> to vector<8x32xf32>
    %70 = arith.index_cast %41 : i32 to index
    %c32 = arith.constant 32 : index
    %71 = vector.load %arg9[%70, %c32] : memref<64x64xf32, #tpu.memory_space<vmem>>, vector<8x32xf32>
    tpu.vector_store %arg9[%70, %c32], %69 {strides = array<i32>} : memref<64x64xf32, #tpu.memory_space<vmem>>, vector<8x32xf32>,
    %72 = arith.truncf %65 : vector<8x64xf32> to vector<8x64xbf16>
    %c1_i32_24 = arith.constant 1 : i32
    %c8_i32_25 = arith.constant 8 : i32
    %73 = arith.muli %c1_i32_24, %c8_i32_25 : i32
    %74 = tpu.assume_multiple %73, 8 : i32
    %c7_i32_26 = arith.constant 7 : i32
    %75 = arith.subi %c7_i32_26, %c1_i32_24 : i32
    %c8_i32_27 = arith.constant 8 : i32
    %76 = arith.muli %75, %c8_i32_27 : i32
    %77 = tpu.assume_multiple %76, 8 : i32
    %78 = arith.index_cast %74 : i32 to index
    %c0_28 = arith.constant 0 : index
    %79 = vector.load %arg8[%78, %c0_28] : memref<64x256xf32, #tpu.memory_space<vmem>>, vector<8x256xf32>
    %80 = arith.index_cast %77 : i32 to index
    %c0_29 = arith.constant 0 : index
    %81 = vector.load %arg8[%80, %c0_29] : memref<64x256xf32, #tpu.memory_space<vmem>>, vector<8x256xf32>
    %82 = arith.select %34, %79, %81 : vector<8x256xi1>, vector<8x256xf32>
    %83 = arith.addf %82, %15 : vector<8x256xf32>
    %c0_30 = arith.constant 0 : index
    %c0_31 = arith.constant 0 : index
    %84 = vector.load %arg3[%c0_30, %c0_31] : memref<64x256xbf16, #tpu.memory_space<vmem>>, vector<64x256xbf16>
    %cst_32 = arith.constant dense<0.000000e+00> : vector<8x256xf32>
    %85 = tpu.matmul %72, %84, %cst_32 {dimension_numbers = #tpu.dot_dimension_numbers<[1], [0], [0], [1], [0, 0, 1, 1], [], []>} : vector<8x64xbf16>, vector<64x256xbf16>, vector<8x256xf32> -> vector<8x256xf32>
    %86 = arith.addf %83, %85 : vector<8x256xf32>
    %87 = arith.negf %86 : vector<8x256xf32>
    %88 = math.exp %87 : vector<8x256xf32>
    %cst_33 = arith.constant 1.000000e+00 : f32
    %89 = vector.broadcast %cst_33 : f32 to vector<8x256xf32>
    %90 = arith.addf %89, %88 : vector<8x256xf32>
    %91 = arith.divf %89, %90 : vector<8x256xf32>
    %92 = vector.extract_strided_slice %91 {offsets = [0, 0], sizes = [8, 64], strides = [1, 1]} : vector<8x256xf32> to vector<8x64xf32>
    %93 = vector.extract_strided_slice %91 {offsets = [0, 64], sizes = [8, 64], strides = [1, 1]} : vector<8x256xf32> to vector<8x64xf32>
    %94 = vector.extract_strided_slice %91 {offsets = [0, 192], sizes = [8, 64], strides = [1, 1]} : vector<8x256xf32> to vector<8x64xf32>
    %95 = vector.extract_strided_slice %86 {offsets = [0, 128], sizes = [8, 64], strides = [1, 1]} : vector<8x256xf32> to vector<8x64xf32>
    %96 = math.tanh %95 : vector<8x64xf32>
    %97 = arith.mulf %93, %63 : vector<8x64xf32>
    %98 = arith.mulf %92, %96 : vector<8x64xf32>
    %99 = arith.addf %97, %98 : vector<8x64xf32>
    %100 = math.tanh %99 : vector<8x64xf32>
    %101 = arith.mulf %94, %100 : vector<8x64xf32>
    %102 = vector.extract_strided_slice %101 {offsets = [0, 0], sizes = [8, 32], strides = [1, 1]} : vector<8x64xf32> to vector<8x32xf32>
    %103 = arith.index_cast %74 : i32 to index
    %c0_34 = arith.constant 0 : index
    %104 = vector.load %arg9[%103, %c0_34] : memref<64x64xf32, #tpu.memory_space<vmem>>, vector<8x32xf32>
    tpu.vector_store %arg9[%103, %c0_34], %102 {strides = array<i32>} : memref<64x64xf32, #tpu.memory_space<vmem>>, vector<8x32xf32>,
    %105 = vector.extract_strided_slice %101 {offsets = [0, 32], sizes = [8, 32], strides = [1, 1]} : vector<8x64xf32> to vector<8x32xf32>
    %106 = arith.index_cast %77 : i32 to index
    %c32_35 = arith.constant 32 : index
    %107 = vector.load %arg9[%106, %c32_35] : memref<64x64xf32, #tpu.memory_space<vmem>>, vector<8x32xf32>
    tpu.vector_store %arg9[%106, %c32_35], %105 {strides = array<i32>} : memref<64x64xf32, #tpu.memory_space<vmem>>, vector<8x32xf32>,
    %108 = arith.truncf %101 : vector<8x64xf32> to vector<8x64xbf16>
    %c2_i32 = arith.constant 2 : i32
    %c8_i32_36 = arith.constant 8 : i32
    %109 = arith.muli %c2_i32, %c8_i32_36 : i32
    %110 = tpu.assume_multiple %109, 8 : i32
    %c7_i32_37 = arith.constant 7 : i32
    %111 = arith.subi %c7_i32_37, %c2_i32 : i32
    %c8_i32_38 = arith.constant 8 : i32
    %112 = arith.muli %111, %c8_i32_38 : i32
    %113 = tpu.assume_multiple %112, 8 : i32
    %114 = arith.index_cast %110 : i32 to index
    %c0_39 = arith.constant 0 : index
    %115 = vector.load %arg8[%114, %c0_39] : memref<64x256xf32, #tpu.memory_space<vmem>>, vector<8x256xf32>
    %116 = arith.index_cast %113 : i32 to index
    %c0_40 = arith.constant 0 : index
    %117 = vector.load %arg8[%116, %c0_40] : memref<64x256xf32, #tpu.memory_space<vmem>>, vector<8x256xf32>
    %118 = arith.select %34, %115, %117 : vector<8x256xi1>, vector<8x256xf32>
    %119 = arith.addf %118, %15 : vector<8x256xf32>
    %c0_41 = arith.constant 0 : index
    %c0_42 = arith.constant 0 : index
    %120 = vector.load %arg3[%c0_41, %c0_42] : memref<64x256xbf16, #tpu.memory_space<vmem>>, vector<64x256xbf16>
    %cst_43 = arith.constant dense<0.000000e+00> : vector<8x256xf32>
    %121 = tpu.matmul %108, %120, %cst_43 {dimension_numbers = #tpu.dot_dimension_numbers<[1], [0], [0], [1], [0, 0, 1, 1], [], []>} : vector<8x64xbf16>, vector<64x256xbf16>, vector<8x256xf32> -> vector<8x256xf32>
    %122 = arith.addf %119, %121 : vector<8x256xf32>
    %123 = arith.negf %122 : vector<8x256xf32>
    %124 = math.exp %123 : vector<8x256xf32>
    %cst_44 = arith.constant 1.000000e+00 : f32
    %125 = vector.broadcast %cst_44 : f32 to vector<8x256xf32>
    %126 = arith.addf %125, %124 : vector<8x256xf32>
    %127 = arith.divf %125, %126 : vector<8x256xf32>
    %128 = vector.extract_strided_slice %127 {offsets = [0, 0], sizes = [8, 64], strides = [1, 1]} : vector<8x256xf32> to vector<8x64xf32>
    %129 = vector.extract_strided_slice %127 {offsets = [0, 64], sizes = [8, 64], strides = [1, 1]} : vector<8x256xf32> to vector<8x64xf32>
    %130 = vector.extract_strided_slice %127 {offsets = [0, 192], sizes = [8, 64], strides = [1, 1]} : vector<8x256xf32> to vector<8x64xf32>
    %131 = vector.extract_strided_slice %122 {offsets = [0, 128], sizes = [8, 64], strides = [1, 1]} : vector<8x256xf32> to vector<8x64xf32>
    %132 = math.tanh %131 : vector<8x64xf32>
    %133 = arith.mulf %129, %99 : vector<8x64xf32>
    %134 = arith.mulf %128, %132 : vector<8x64xf32>
    %135 = arith.addf %133, %134 : vector<8x64xf32>
    %136 = math.tanh %135 : vector<8x64xf32>
    %137 = arith.mulf %130, %136 : vector<8x64xf32>
    %138 = vector.extract_strided_slice %137 {offsets = [0, 0], sizes = [8, 32], strides = [1, 1]} : vector<8x64xf32> to vector<8x32xf32>
    %139 = arith.index_cast %110 : i32 to index
    %c0_45 = arith.constant 0 : index
    %140 = vector.load %arg9[%139, %c0_45] : memref<64x64xf32, #tpu.memory_space<vmem>>, vector<8x32xf32>
    tpu.vector_store %arg9[%139, %c0_45], %138 {strides = array<i32>} : memref<64x64xf32, #tpu.memory_space<vmem>>, vector<8x32xf32>,
    %141 = vector.extract_strided_slice %137 {offsets = [0, 32], sizes = [8, 32], strides = [1, 1]} : vector<8x64xf32> to vector<8x32xf32>
    %142 = arith.index_cast %113 : i32 to index
    %c32_46 = arith.constant 32 : index
    %143 = vector.load %arg9[%142, %c32_46] : memref<64x64xf32, #tpu.memory_space<vmem>>, vector<8x32xf32>
    tpu.vector_store %arg9[%142, %c32_46], %141 {strides = array<i32>} : memref<64x64xf32, #tpu.memory_space<vmem>>, vector<8x32xf32>,
    %144 = arith.truncf %137 : vector<8x64xf32> to vector<8x64xbf16>
    %c3_i32 = arith.constant 3 : i32
    %c8_i32_47 = arith.constant 8 : i32
    %145 = arith.muli %c3_i32, %c8_i32_47 : i32
    %146 = tpu.assume_multiple %145, 8 : i32
    %c7_i32_48 = arith.constant 7 : i32
    %147 = arith.subi %c7_i32_48, %c3_i32 : i32
    %c8_i32_49 = arith.constant 8 : i32
    %148 = arith.muli %147, %c8_i32_49 : i32
    %149 = tpu.assume_multiple %148, 8 : i32
    %150 = arith.index_cast %146 : i32 to index
    %c0_50 = arith.constant 0 : index
    %151 = vector.load %arg8[%150, %c0_50] : memref<64x256xf32, #tpu.memory_space<vmem>>, vector<8x256xf32>
    %152 = arith.index_cast %149 : i32 to index
    %c0_51 = arith.constant 0 : index
    %153 = vector.load %arg8[%152, %c0_51] : memref<64x256xf32, #tpu.memory_space<vmem>>, vector<8x256xf32>
    %154 = arith.select %34, %151, %153 : vector<8x256xi1>, vector<8x256xf32>
    %155 = arith.addf %154, %15 : vector<8x256xf32>
    %c0_52 = arith.constant 0 : index
    %c0_53 = arith.constant 0 : index
    %156 = vector.load %arg3[%c0_52, %c0_53] : memref<64x256xbf16, #tpu.memory_space<vmem>>, vector<64x256xbf16>
    %cst_54 = arith.constant dense<0.000000e+00> : vector<8x256xf32>
    %157 = tpu.matmul %144, %156, %cst_54 {dimension_numbers = #tpu.dot_dimension_numbers<[1], [0], [0], [1], [0, 0, 1, 1], [], []>} : vector<8x64xbf16>, vector<64x256xbf16>, vector<8x256xf32> -> vector<8x256xf32>
    %158 = arith.addf %155, %157 : vector<8x256xf32>
    %159 = arith.negf %158 : vector<8x256xf32>
    %160 = math.exp %159 : vector<8x256xf32>
    %cst_55 = arith.constant 1.000000e+00 : f32
    %161 = vector.broadcast %cst_55 : f32 to vector<8x256xf32>
    %162 = arith.addf %161, %160 : vector<8x256xf32>
    %163 = arith.divf %161, %162 : vector<8x256xf32>
    %164 = vector.extract_strided_slice %163 {offsets = [0, 0], sizes = [8, 64], strides = [1, 1]} : vector<8x256xf32> to vector<8x64xf32>
    %165 = vector.extract_strided_slice %163 {offsets = [0, 64], sizes = [8, 64], strides = [1, 1]} : vector<8x256xf32> to vector<8x64xf32>
    %166 = vector.extract_strided_slice %163 {offsets = [0, 192], sizes = [8, 64], strides = [1, 1]} : vector<8x256xf32> to vector<8x64xf32>
    %167 = vector.extract_strided_slice %158 {offsets = [0, 128], sizes = [8, 64], strides = [1, 1]} : vector<8x256xf32> to vector<8x64xf32>
    %168 = math.tanh %167 : vector<8x64xf32>
    %169 = arith.mulf %165, %135 : vector<8x64xf32>
    %170 = arith.mulf %164, %168 : vector<8x64xf32>
    %171 = arith.addf %169, %170 : vector<8x64xf32>
    %172 = math.tanh %171 : vector<8x64xf32>
    %173 = arith.mulf %166, %172 : vector<8x64xf32>
    %174 = vector.extract_strided_slice %173 {offsets = [0, 0], sizes = [8, 32], strides = [1, 1]} : vector<8x64xf32> to vector<8x32xf32>
    %175 = arith.index_cast %146 : i32 to index
    %c0_56 = arith.constant 0 : index
    %176 = vector.load %arg9[%175, %c0_56] : memref<64x64xf32, #tpu.memory_space<vmem>>, vector<8x32xf32>
    tpu.vector_store %arg9[%175, %c0_56], %174 {strides = array<i32>} : memref<64x64xf32, #tpu.memory_space<vmem>>, vector<8x32xf32>,
    %177 = vector.extract_strided_slice %173 {offsets = [0, 32], sizes = [8, 32], strides = [1, 1]} : vector<8x64xf32> to vector<8x32xf32>
    %178 = arith.index_cast %149 : i32 to index
    %c32_57 = arith.constant 32 : index
    %179 = vector.load %arg9[%178, %c32_57] : memref<64x64xf32, #tpu.memory_space<vmem>>, vector<8x32xf32>
    tpu.vector_store %arg9[%178, %c32_57], %177 {strides = array<i32>} : memref<64x64xf32, #tpu.memory_space<vmem>>, vector<8x32xf32>,
    %180 = arith.truncf %173 : vector<8x64xf32> to vector<8x64xbf16>
    %c4_i32 = arith.constant 4 : i32
    %c8_i32_58 = arith.constant 8 : i32
    %181 = arith.muli %c4_i32, %c8_i32_58 : i32
    %182 = tpu.assume_multiple %181, 8 : i32
    %c7_i32_59 = arith.constant 7 : i32
    %183 = arith.subi %c7_i32_59, %c4_i32 : i32
    %c8_i32_60 = arith.constant 8 : i32
    %184 = arith.muli %183, %c8_i32_60 : i32
    %185 = tpu.assume_multiple %184, 8 : i32
    %186 = arith.index_cast %182 : i32 to index
    %c0_61 = arith.constant 0 : index
    %187 = vector.load %arg8[%186, %c0_61] : memref<64x256xf32, #tpu.memory_space<vmem>>, vector<8x256xf32>
    %188 = arith.index_cast %185 : i32 to index
    %c0_62 = arith.constant 0 : index
    %189 = vector.load %arg8[%188, %c0_62] : memref<64x256xf32, #tpu.memory_space<vmem>>, vector<8x256xf32>
    %190 = arith.select %34, %187, %189 : vector<8x256xi1>, vector<8x256xf32>
    %191 = arith.addf %190, %15 : vector<8x256xf32>
    %c0_63 = arith.constant 0 : index
    %c0_64 = arith.constant 0 : index
    %192 = vector.load %arg3[%c0_63, %c0_64] : memref<64x256xbf16, #tpu.memory_space<vmem>>, vector<64x256xbf16>
    %cst_65 = arith.constant dense<0.000000e+00> : vector<8x256xf32>
    %193 = tpu.matmul %180, %192, %cst_65 {dimension_numbers = #tpu.dot_dimension_numbers<[1], [0], [0], [1], [0, 0, 1, 1], [], []>} : vector<8x64xbf16>, vector<64x256xbf16>, vector<8x256xf32> -> vector<8x256xf32>
    %194 = arith.addf %191, %193 : vector<8x256xf32>
    %195 = arith.negf %194 : vector<8x256xf32>
    %196 = math.exp %195 : vector<8x256xf32>
    %cst_66 = arith.constant 1.000000e+00 : f32
    %197 = vector.broadcast %cst_66 : f32 to vector<8x256xf32>
    %198 = arith.addf %197, %196 : vector<8x256xf32>
    %199 = arith.divf %197, %198 : vector<8x256xf32>
    %200 = vector.extract_strided_slice %199 {offsets = [0, 0], sizes = [8, 64], strides = [1, 1]} : vector<8x256xf32> to vector<8x64xf32>
    %201 = vector.extract_strided_slice %199 {offsets = [0, 64], sizes = [8, 64], strides = [1, 1]} : vector<8x256xf32> to vector<8x64xf32>
    %202 = vector.extract_strided_slice %199 {offsets = [0, 192], sizes = [8, 64], strides = [1, 1]} : vector<8x256xf32> to vector<8x64xf32>
    %203 = vector.extract_strided_slice %194 {offsets = [0, 128], sizes = [8, 64], strides = [1, 1]} : vector<8x256xf32> to vector<8x64xf32>
    %204 = math.tanh %203 : vector<8x64xf32>
    %205 = arith.mulf %201, %171 : vector<8x64xf32>
    %206 = arith.mulf %200, %204 : vector<8x64xf32>
    %207 = arith.addf %205, %206 : vector<8x64xf32>
    %208 = math.tanh %207 : vector<8x64xf32>
    %209 = arith.mulf %202, %208 : vector<8x64xf32>
    %210 = vector.extract_strided_slice %209 {offsets = [0, 0], sizes = [8, 32], strides = [1, 1]} : vector<8x64xf32> to vector<8x32xf32>
    %211 = arith.index_cast %182 : i32 to index
    %c0_67 = arith.constant 0 : index
    %212 = vector.load %arg9[%211, %c0_67] : memref<64x64xf32, #tpu.memory_space<vmem>>, vector<8x32xf32>
    tpu.vector_store %arg9[%211, %c0_67], %210 {strides = array<i32>} : memref<64x64xf32, #tpu.memory_space<vmem>>, vector<8x32xf32>,
    %213 = vector.extract_strided_slice %209 {offsets = [0, 32], sizes = [8, 32], strides = [1, 1]} : vector<8x64xf32> to vector<8x32xf32>
    %214 = arith.index_cast %185 : i32 to index
    %c32_68 = arith.constant 32 : index
    %215 = vector.load %arg9[%214, %c32_68] : memref<64x64xf32, #tpu.memory_space<vmem>>, vector<8x32xf32>
    tpu.vector_store %arg9[%214, %c32_68], %213 {strides = array<i32>} : memref<64x64xf32, #tpu.memory_space<vmem>>, vector<8x32xf32>,
    %216 = arith.truncf %209 : vector<8x64xf32> to vector<8x64xbf16>
    %c5_i32 = arith.constant 5 : i32
    %c8_i32_69 = arith.constant 8 : i32
    %217 = arith.muli %c5_i32, %c8_i32_69 : i32
    %218 = tpu.assume_multiple %217, 8 : i32
    %c7_i32_70 = arith.constant 7 : i32
    %219 = arith.subi %c7_i32_70, %c5_i32 : i32
    %c8_i32_71 = arith.constant 8 : i32
    %220 = arith.muli %219, %c8_i32_71 : i32
    %221 = tpu.assume_multiple %220, 8 : i32
    %222 = arith.index_cast %218 : i32 to index
    %c0_72 = arith.constant 0 : index
    %223 = vector.load %arg8[%222, %c0_72] : memref<64x256xf32, #tpu.memory_space<vmem>>, vector<8x256xf32>
    %224 = arith.index_cast %221 : i32 to index
    %c0_73 = arith.constant 0 : index
    %225 = vector.load %arg8[%224, %c0_73] : memref<64x256xf32, #tpu.memory_space<vmem>>, vector<8x256xf32>
    %226 = arith.select %34, %223, %225 : vector<8x256xi1>, vector<8x256xf32>
    %227 = arith.addf %226, %15 : vector<8x256xf32>
    %c0_74 = arith.constant 0 : index
    %c0_75 = arith.constant 0 : index
    %228 = vector.load %arg3[%c0_74, %c0_75] : memref<64x256xbf16, #tpu.memory_space<vmem>>, vector<64x256xbf16>
    %cst_76 = arith.constant dense<0.000000e+00> : vector<8x256xf32>
    %229 = tpu.matmul %216, %228, %cst_76 {dimension_numbers = #tpu.dot_dimension_numbers<[1], [0], [0], [1], [0, 0, 1, 1], [], []>} : vector<8x64xbf16>, vector<64x256xbf16>, vector<8x256xf32> -> vector<8x256xf32>
    %230 = arith.addf %227, %229 : vector<8x256xf32>
    %231 = arith.negf %230 : vector<8x256xf32>
    %232 = math.exp %231 : vector<8x256xf32>
    %cst_77 = arith.constant 1.000000e+00 : f32
    %233 = vector.broadcast %cst_77 : f32 to vector<8x256xf32>
    %234 = arith.addf %233, %232 : vector<8x256xf32>
    %235 = arith.divf %233, %234 : vector<8x256xf32>
    %236 = vector.extract_strided_slice %235 {offsets = [0, 0], sizes = [8, 64], strides = [1, 1]} : vector<8x256xf32> to vector<8x64xf32>
    %237 = vector.extract_strided_slice %235 {offsets = [0, 64], sizes = [8, 64], strides = [1, 1]} : vector<8x256xf32> to vector<8x64xf32>
    %238 = vector.extract_strided_slice %235 {offsets = [0, 192], sizes = [8, 64], strides = [1, 1]} : vector<8x256xf32> to vector<8x64xf32>
    %239 = vector.extract_strided_slice %230 {offsets = [0, 128], sizes = [8, 64], strides = [1, 1]} : vector<8x256xf32> to vector<8x64xf32>
    %240 = math.tanh %239 : vector<8x64xf32>
    %241 = arith.mulf %237, %207 : vector<8x64xf32>
    %242 = arith.mulf %236, %240 : vector<8x64xf32>
    %243 = arith.addf %241, %242 : vector<8x64xf32>
    %244 = math.tanh %243 : vector<8x64xf32>
    %245 = arith.mulf %238, %244 : vector<8x64xf32>
    %246 = vector.extract_strided_slice %245 {offsets = [0, 0], sizes = [8, 32], strides = [1, 1]} : vector<8x64xf32> to vector<8x32xf32>
    %247 = arith.index_cast %218 : i32 to index
    %c0_78 = arith.constant 0 : index
    %248 = vector.load %arg9[%247, %c0_78] : memref<64x64xf32, #tpu.memory_space<vmem>>, vector<8x32xf32>
    tpu.vector_store %arg9[%247, %c0_78], %246 {strides = array<i32>} : memref<64x64xf32, #tpu.memory_space<vmem>>, vector<8x32xf32>,
    %249 = vector.extract_strided_slice %245 {offsets = [0, 32], sizes = [8, 32], strides = [1, 1]} : vector<8x64xf32> to vector<8x32xf32>
    %250 = arith.index_cast %221 : i32 to index
    %c32_79 = arith.constant 32 : index
    %251 = vector.load %arg9[%250, %c32_79] : memref<64x64xf32, #tpu.memory_space<vmem>>, vector<8x32xf32>
    tpu.vector_store %arg9[%250, %c32_79], %249 {strides = array<i32>} : memref<64x64xf32, #tpu.memory_space<vmem>>, vector<8x32xf32>,
    %252 = arith.truncf %245 : vector<8x64xf32> to vector<8x64xbf16>
    %c6_i32 = arith.constant 6 : i32
    %c8_i32_80 = arith.constant 8 : i32
    %253 = arith.muli %c6_i32, %c8_i32_80 : i32
    %254 = tpu.assume_multiple %253, 8 : i32
    %c7_i32_81 = arith.constant 7 : i32
    %255 = arith.subi %c7_i32_81, %c6_i32 : i32
    %c8_i32_82 = arith.constant 8 : i32
    %256 = arith.muli %255, %c8_i32_82 : i32
    %257 = tpu.assume_multiple %256, 8 : i32
    %258 = arith.index_cast %254 : i32 to index
    %c0_83 = arith.constant 0 : index
    %259 = vector.load %arg8[%258, %c0_83] : memref<64x256xf32, #tpu.memory_space<vmem>>, vector<8x256xf32>
    %260 = arith.index_cast %257 : i32 to index
    %c0_84 = arith.constant 0 : index
    %261 = vector.load %arg8[%260, %c0_84] : memref<64x256xf32, #tpu.memory_space<vmem>>, vector<8x256xf32>
    %262 = arith.select %34, %259, %261 : vector<8x256xi1>, vector<8x256xf32>
    %263 = arith.addf %262, %15 : vector<8x256xf32>
    %c0_85 = arith.constant 0 : index
    %c0_86 = arith.constant 0 : index
    %264 = vector.load %arg3[%c0_85, %c0_86] : memref<64x256xbf16, #tpu.memory_space<vmem>>, vector<64x256xbf16>
    %cst_87 = arith.constant dense<0.000000e+00> : vector<8x256xf32>
    %265 = tpu.matmul %252, %264, %cst_87 {dimension_numbers = #tpu.dot_dimension_numbers<[1], [0], [0], [1], [0, 0, 1, 1], [], []>} : vector<8x64xbf16>, vector<64x256xbf16>, vector<8x256xf32> -> vector<8x256xf32>
    %266 = arith.addf %263, %265 : vector<8x256xf32>
    %267 = arith.negf %266 : vector<8x256xf32>
    %268 = math.exp %267 : vector<8x256xf32>
    %cst_88 = arith.constant 1.000000e+00 : f32
    %269 = vector.broadcast %cst_88 : f32 to vector<8x256xf32>
    %270 = arith.addf %269, %268 : vector<8x256xf32>
    %271 = arith.divf %269, %270 : vector<8x256xf32>
    %272 = vector.extract_strided_slice %271 {offsets = [0, 0], sizes = [8, 64], strides = [1, 1]} : vector<8x256xf32> to vector<8x64xf32>
    %273 = vector.extract_strided_slice %271 {offsets = [0, 64], sizes = [8, 64], strides = [1, 1]} : vector<8x256xf32> to vector<8x64xf32>
    %274 = vector.extract_strided_slice %271 {offsets = [0, 192], sizes = [8, 64], strides = [1, 1]} : vector<8x256xf32> to vector<8x64xf32>
    %275 = vector.extract_strided_slice %266 {offsets = [0, 128], sizes = [8, 64], strides = [1, 1]} : vector<8x256xf32> to vector<8x64xf32>
    %276 = math.tanh %275 : vector<8x64xf32>
    %277 = arith.mulf %273, %243 : vector<8x64xf32>
    %278 = arith.mulf %272, %276 : vector<8x64xf32>
    %279 = arith.addf %277, %278 : vector<8x64xf32>
    %280 = math.tanh %279 : vector<8x64xf32>
    %281 = arith.mulf %274, %280 : vector<8x64xf32>
    %282 = vector.extract_strided_slice %281 {offsets = [0, 0], sizes = [8, 32], strides = [1, 1]} : vector<8x64xf32> to vector<8x32xf32>
    %283 = arith.index_cast %254 : i32 to index
    %c0_89 = arith.constant 0 : index
    %284 = vector.load %arg9[%283, %c0_89] : memref<64x64xf32, #tpu.memory_space<vmem>>, vector<8x32xf32>
    tpu.vector_store %arg9[%283, %c0_89], %282 {strides = array<i32>} : memref<64x64xf32, #tpu.memory_space<vmem>>, vector<8x32xf32>,
    %285 = vector.extract_strided_slice %281 {offsets = [0, 32], sizes = [8, 32], strides = [1, 1]} : vector<8x64xf32> to vector<8x32xf32>
    %286 = arith.index_cast %257 : i32 to index
    %c32_90 = arith.constant 32 : index
    %287 = vector.load %arg9[%286, %c32_90] : memref<64x64xf32, #tpu.memory_space<vmem>>, vector<8x32xf32>
    tpu.vector_store %arg9[%286, %c32_90], %285 {strides = array<i32>} : memref<64x64xf32, #tpu.memory_space<vmem>>, vector<8x32xf32>,
    %288 = arith.truncf %281 : vector<8x64xf32> to vector<8x64xbf16>
    %c7_i32_91 = arith.constant 7 : i32
    %c8_i32_92 = arith.constant 8 : i32
    %289 = arith.muli %c7_i32_91, %c8_i32_92 : i32
    %290 = tpu.assume_multiple %289, 8 : i32
    %c7_i32_93 = arith.constant 7 : i32
    %291 = arith.subi %c7_i32_93, %c7_i32_91 : i32
    %c8_i32_94 = arith.constant 8 : i32
    %292 = arith.muli %291, %c8_i32_94 : i32
    %293 = tpu.assume_multiple %292, 8 : i32
    %294 = arith.index_cast %290 : i32 to index
    %c0_95 = arith.constant 0 : index
    %295 = vector.load %arg8[%294, %c0_95] : memref<64x256xf32, #tpu.memory_space<vmem>>, vector<8x256xf32>
    %296 = arith.index_cast %293 : i32 to index
    %c0_96 = arith.constant 0 : index
    %297 = vector.load %arg8[%296, %c0_96] : memref<64x256xf32, #tpu.memory_space<vmem>>, vector<8x256xf32>
    %298 = arith.select %34, %295, %297 : vector<8x256xi1>, vector<8x256xf32>
    %299 = arith.addf %298, %15 : vector<8x256xf32>
    %c0_97 = arith.constant 0 : index
    %c0_98 = arith.constant 0 : index
    %300 = vector.load %arg3[%c0_97, %c0_98] : memref<64x256xbf16, #tpu.memory_space<vmem>>, vector<64x256xbf16>
    %cst_99 = arith.constant dense<0.000000e+00> : vector<8x256xf32>
    %301 = tpu.matmul %288, %300, %cst_99 {dimension_numbers = #tpu.dot_dimension_numbers<[1], [0], [0], [1], [0, 0, 1, 1], [], []>} : vector<8x64xbf16>, vector<64x256xbf16>, vector<8x256xf32> -> vector<8x256xf32>
    %302 = arith.addf %299, %301 : vector<8x256xf32>
    %303 = arith.negf %302 : vector<8x256xf32>
    %304 = math.exp %303 : vector<8x256xf32>
    %cst_100 = arith.constant 1.000000e+00 : f32
    %305 = vector.broadcast %cst_100 : f32 to vector<8x256xf32>
    %306 = arith.addf %305, %304 : vector<8x256xf32>
    %307 = arith.divf %305, %306 : vector<8x256xf32>
    %308 = vector.extract_strided_slice %307 {offsets = [0, 0], sizes = [8, 64], strides = [1, 1]} : vector<8x256xf32> to vector<8x64xf32>
    %309 = vector.extract_strided_slice %307 {offsets = [0, 64], sizes = [8, 64], strides = [1, 1]} : vector<8x256xf32> to vector<8x64xf32>
    %310 = vector.extract_strided_slice %307 {offsets = [0, 192], sizes = [8, 64], strides = [1, 1]} : vector<8x256xf32> to vector<8x64xf32>
    %311 = vector.extract_strided_slice %302 {offsets = [0, 128], sizes = [8, 64], strides = [1, 1]} : vector<8x256xf32> to vector<8x64xf32>
    %312 = math.tanh %311 : vector<8x64xf32>
    %313 = arith.mulf %309, %279 : vector<8x64xf32>
    %314 = arith.mulf %308, %312 : vector<8x64xf32>
    %315 = arith.addf %313, %314 : vector<8x64xf32>
    %316 = math.tanh %315 : vector<8x64xf32>
    %317 = arith.mulf %310, %316 : vector<8x64xf32>
    %318 = vector.extract_strided_slice %317 {offsets = [0, 0], sizes = [8, 32], strides = [1, 1]} : vector<8x64xf32> to vector<8x32xf32>
    %319 = arith.index_cast %290 : i32 to index
    %c0_101 = arith.constant 0 : index
    %320 = vector.load %arg9[%319, %c0_101] : memref<64x64xf32, #tpu.memory_space<vmem>>, vector<8x32xf32>
    tpu.vector_store %arg9[%319, %c0_101], %318 {strides = array<i32>} : memref<64x64xf32, #tpu.memory_space<vmem>>, vector<8x32xf32>,
    %321 = vector.extract_strided_slice %317 {offsets = [0, 32], sizes = [8, 32], strides = [1, 1]} : vector<8x64xf32> to vector<8x32xf32>
    %322 = arith.index_cast %293 : i32 to index
    %c32_102 = arith.constant 32 : index
    %323 = vector.load %arg9[%322, %c32_102] : memref<64x64xf32, #tpu.memory_space<vmem>>, vector<8x32xf32>
    tpu.vector_store %arg9[%322, %c32_102], %321 {strides = array<i32>} : memref<64x64xf32, #tpu.memory_space<vmem>>, vector<8x32xf32>,
    %324 = arith.truncf %317 : vector<8x64xf32> to vector<8x64xbf16>
    %c8_i32_103 = arith.constant 8 : i32
    %c0_104 = arith.constant 0 : index
    %c0_105 = arith.constant 0 : index
    %325 = vector.load %arg9[%c0_104, %c0_105] : memref<64x64xf32, #tpu.memory_space<vmem>>, vector<64x64xf32>
    %326 = arith.truncf %325 : vector<64x64xf32> to vector<64x64xbf16>
    %c0_106 = arith.constant 0 : index
    %c0_107 = arith.constant 0 : index
    %327 = vector.load %arg5[%c0_106, %c0_107] : memref<64x128xbf16, #tpu.memory_space<vmem>>, vector<64x128xbf16>
    %cst_108 = arith.constant dense<0.000000e+00> : vector<64x128xf32>
    %328 = tpu.matmul %326, %327, %cst_108 {dimension_numbers = #tpu.dot_dimension_numbers<[1], [0], [0], [1], [0, 0, 1, 1], [], []>} : vector<64x64xbf16>, vector<64x128xbf16>, vector<64x128xf32> -> vector<64x128xf32>
    %c0_109 = arith.constant 0 : index
    %c0_110 = arith.constant 0 : index
    %329 = vector.load %arg6[%c0_109, %c0_110] : memref<1x128xf32, #tpu.memory_space<vmem>>, vector<1x128xf32>
    %330 = vector.broadcast %329 : vector<1x128xf32> to vector<64x128xf32>
    %331 = arith.addf %328, %330 : vector<64x128xf32>
    %c0_111 = arith.constant 0 : index
    %c0_112 = arith.constant 0 : index
    %332 = vector.load %arg7[%c0_111, %c0_112] : memref<64x128xf32, #tpu.memory_space<vmem>>, vector<64x128xf32>
    tpu.vector_store %arg7[%c0_111, %c0_112], %331 {strides = array<i32>} : memref<64x128xf32, #tpu.memory_space<vmem>>, vector<64x128xf32>,
    return
  }
}

</mosaic_0001>

<bundles_post_ra>
// kernel: tpu_custom_call.1
= control target key start
LH: loop header
LB: loop body
LE: loop exit
PB: predicated region body
PF: predicated region fallthrough
CT: control target
= control target key end

     0   :  { %12 = vsyncpa [#allocation5], 0  ;;  %s2422_s0 = inlined_call_operand.vmem [shape: s32[64,1], index: 0, kind: input, shape index: {}]   ;;  %s2423_s1 = inlined_call_operand.vmem [shape: bf16[16,32], index: 1, kind: input, shape index: {}]   ;;  %s2424_s2 = inlined_call_operand.hbm [shape: bf16[32,256], index: 2, kind: input, shape index: {}]   ;;  %s2425_s3 = inlined_call_operand.vmem [shape: bf16[64,256], index: 3, kind: input, shape index: {}]   ;;  %s2426_s4 = inlined_call_operand.vmem [shape: f32[1,256], index: 4, kind: input, shape index: {}]   ;;  %s2427_s5 = inlined_call_operand.hbm [shape: bf16[64,128], index: 5, kind: input, shape index: {}]   ;;  %s2428_s6 = inlined_call_operand.vmem [shape: f32[1,128], index: 6, kind: input, shape index: {}]   ;;  %s2429_s7 = inlined_call_operand.hbm [shape: f32[64,128], index: 7, kind: output, shape index: {}]  }
   0x1   :  { %13 = vsyncpa [#allocation8], 0 }
   0x2   :  { %14 = vsyncpa [#allocation6], 0  ;;  %s1993_s24 = smov [#allocation4]   ;;  %s1921_s28 = scalar_lea.hbm %s2424_s2, 512 }
   0x3   :  { %s24_s25 = sshll.u32 %s1993_s24, 4  ;;  %p1922_p0 = scmp.ne.s32.totalorder %s2424_s2, %s1921_s28  ;;  %s25_s25 = int_to_ptr.vmem [resolvable:$true] %s24_s25 }
   0x4   :  { %p1925_p1 = scmp.lt.u32.totalorder %s1921_s28, %s2424_s2 }
   0x6   :  { %p1927_p2 = pnand %p1925_p1, %p1922_p0 }
   0x8   :  { %1930 = shalt.err (!%p1927_p2)
}
   0x9   :  { %s1931_s10 = scalar_lea.vmem %s25_s25, 512  ;;  %p1936_p4 = scmp.lt.s32.totalorder %s25_s25, %s25_s25 }
   0xa   :  { %p1932_p3 = scmp.ne.s32.totalorder %s25_s25, %s1931_s10  ;;  %p1937_p5 = scmp.lt.s32.totalorder %s1931_s10, %s1931_s10 }
   0xc   :  { %p1938_p6 = por %p1937_p5, %p1936_p4 }
   0xe   :  { %p1939_p7 = pnand %p1938_p6, %p1932_p3 }
  0x10   :  { %1942 = shalt.err (!%p1939_p7)
}
  0x11   :  { %s1994_s11 = smov 128   ;;  %s1995_s12 = smov 8  }
  0x12   :  { %30 = dma.hbm_to_vmem [thread:$0]  %s2424_s2, 512, %s25_s25, [#allocation5], %s1994_s11, %s1994_s11, %s1995_s12  }
  0x13   :  { %s1996_s15 = smov [#allocation7]   ;;  %s1943_s19 = scalar_lea.hbm %s2427_s5, 512 }
  0x14   :  { %s40_s16 = sshll.u32 %s1996_s15, 4  ;;  %p1944_p8 = scmp.ne.s32.totalorder %s2427_s5, %s1943_s19  ;;  %s41_s16 = int_to_ptr.vmem [resolvable:$true] %s40_s16 }
  0x15   :  { %p1947_p9 = scmp.lt.u32.totalorder %s1943_s19, %s2427_s5 }
  0x17   :  { %p1949_p10 = pnand %p1947_p9, %p1944_p8 }
  0x19   :  { %1952 = shalt.err (!%p1949_p10)
}
  0x1a   :  { %s1953_s24 = scalar_lea.vmem %s41_s16, 512  ;;  %p1958_p12 = scmp.lt.s32.totalorder %s41_s16, %s41_s16 }
  0x1b   :  { %p1954_p11 = scmp.ne.s32.totalorder %s41_s16, %s1953_s24  ;;  %p1959_p13 = scmp.lt.s32.totalorder %s1953_s24, %s1953_s24 }
  0x1d   :  { %p1960_p0 = por %p1959_p13, %p1958_p12 }
  0x1f   :  { %p1961_p1 = pnand %p1960_p0, %p1954_p11 }
  0x21   :  { %1964 = shalt.err (!%p1961_p1)
}
  0x22   :  { %s1997_s2 = smov 64   ;;  %s1998_s25 = smov 4  }
  0x23   :  { %46 = dma.hbm_to_vmem [thread:$0]  %s2427_s5, 512, %s41_s16, [#allocation8], %s1997_s2, %s1997_s2, %s1998_s25  }
  0x24   :  { %1987 = dma.done.wait [#allocation5], 512  }
  0x25   :  { %1988 = vsyncadd [#allocation5], 4294966784 }
  0x26   :  { %1989 = dma.done.wait [#allocation8], 512  }
  0x27   :  { %1990 = vsyncadd [#allocation8], 4294966784  ;;  %v1999_v0 = vmov 0   ;;  %v60_v1 = vld [vmem:[%s2422_s0 + $0x10] sm:$0xff]  ;;  %v58_v2 = vld [vmem:[%s2422_s0] sm:$0xff]  ;;  %v56_v12 = vlaneseq  ;;  %vm126_vm4 = vcmask 130048  }
  0x28   :  { %1801 = vset.pattern.permute.xlu1 %v1999_v0  ;;  %1800 = vset.pattern.permute.xlu0 %v1999_v0  ;;  %v61_v3 = vld [vmem:[%s2422_s0 + $0x18] sm:$0xff]  ;;  %v59_v4 = vld [vmem:[%s2422_s0 + $0x8] sm:$0xff]  ;;  %v62_v6 = vld [vmem:[%s2422_s0 + $0x20] sm:$0xff]  ;;  %v2000_v18 = vmov 0.0   ;;  %vm232_vm9 = vcmask 261120   ;;  %vm435_vm12 = vcmask 523264  }
  0x29   :  { %277 = vmatprep.mubr.bf16.mxu1 %v1999_v0  ;;  %73 = vperm.xlu1 %1801, %v60_v1   ;;  %v63_v5 = vld [vmem:[%s2422_s0 + $0x28] sm:$0xff]  ;;  %v1802_v7 = vld [vmem:[%s2423_s1] sm:$0xff]   ;;  %v65_v8 = vld [vmem:[%s2422_s0 + $0x38] sm:$0xff]  ;;  %v2102_v13 = vand.u32 127, %v56_v12  ;;  %vm510_vm13 = vcmask 523520   ;;  %s2001_s17 = smov [#allocation9]  }
  0x2a   :  { %67 = vperm.xlu0 %1800, %v58_v2   ;;  %1765 = vmatprep.subr.bf16.mxu0 %v1802_v7  ;;  %v64_v9 = vld [vmem:[%s2422_s0 + $0x30] sm:$0xff]  ;;  %v1803_v10 = vld [vmem:[#allocation4 + $0x4] ss:$8 sps:$4 sm:$0xff]   ;;  %v1805_v11 = vld [vmem:[#allocation4] ss:$8 sps:$4 sm:$0xff]   ;;  %v337_v2 = vshrl.u32 %v56_v12, 7 }
  0x2b   :  { %1766 = vmatpush3.bf16.msra.mxu0 %v1802_v7  ;;  %245 = vmatprep.subr.bf16.mxu1 %v1803_v10  ;;  %v1806_v35 = vld [vmem:[#allocation4 + $0x14] ss:$8 sps:$4 sm:$0xff]   ;;  %v1808_v36 = vld [vmem:[#allocation4 + $0x10] ss:$8 sps:$4 sm:$0xff]   ;;  %v2120_v37 = vld [vmem:[%s2425_s3] ss:$8 sps:$4 sm:$0xff]  }
  0x2c   :  { %246 = vmatpush1.bf16.msra.mxu1 %v1805_v11  ;;  %v2125_v38 = vld [vmem:[%s2425_s3 + $0x4] ss:$8 sps:$4 sm:$0xff]   ;;  %v2130_v39 = vld [vmem:[%s2425_s3 + $0x14] ss:$8 sps:$4 sm:$0xff]   ;;  %v2138_v40 = vld [vmem:[%s2425_s3 + $0x10] ss:$8 sps:$4 sm:$0xff]  }
  0x2d   :  { %76 = vperm.xlu1 %1801, %v61_v3   ;;  %247 = vmatprep.subr.bf16.mxu1 %v1806_v35  ;;  %v2145_v41 = vld [vmem:[%s2425_s3 + $0x20] ss:$8 sps:$4 sm:$0xff]   ;;  %v2150_v42 = vld [vmem:[%s2425_s3 + $0x24] ss:$8 sps:$4 sm:$0xff]   ;;  %v2155_v43 = vld [vmem:[%s2425_s3 + $0x34] ss:$8 sps:$4 sm:$0xff]  }
  0x2e   :  { %70 = vperm.xlu0 %1800, %v59_v4   ;;  %439 = vmatprep.subr.bf16.mxu0 %v2125_v38  ;;  %v2162_v44 = vld [vmem:[%s2425_s3 + $0x30] ss:$8 sps:$4 sm:$0xff]   ;;  %v346_v3 = vadd.s32 128, %v2102_v13  ;;  %v351_v7 = vand.u32 63, %v2102_v13  ;;  %v334_v11 = vld [vmem:[%s2426_s4] sm:$0x3] }
  0x2f   :  { %s1615_s18 = sshll.u32 %s2001_s17, 4  ;;  %s1616_s18 = int_to_ptr.vmem [resolvable:$true] %s1615_s18 }
  0x30   :  { %248 = vmatpush1.bf16.msra.mxu1 %v1808_v36  ;;  %v358_v10 = vand.u32 63, %v346_v3  ;;  %vm2203_vm10 = vcmp.lt.s32.totalorder %v351_v7, 32  ;;  %p1970_p3 = scmp.lt.s32.totalorder %s1616_s18, %s1616_s18 }
  0x31   :  { %82 = vperm.xlu1 %1801, %v63_v5   ;;  %723 = vmatprep.subr.bf16.mxu1 %v2125_v38 }
  0x32   :  { %79 = vperm.xlu0 %1800, %v62_v6   ;;  %vm2207_vm11 = vcmp.lt.s32.totalorder %v358_v10, 32 }
  0x35   :  { %88 = vperm.xlu1 %1801, %v65_v8   ;;  %v338_v8 = vsub.s32 0, %v337_v2 }
  0x36   :  { %85 = vperm.xlu0 %1800, %v64_v9  }
  0x37   :  { %v339_v12 = vrot.slane %v334_v11, %v338_v8 }
  0xa8   :  { %v74_v14 = vpop.permute.xlu1 %73 }
  0xa9   :  { %v68_v15 = vpop.permute.xlu0 %67  ;;  %vm92_vm0 = vcmp.eq.s32.totalorder %v74_v14, %v2102_v13  ;;  %v342_v14 = vsub.s32 1, %v337_v2 }
  0xaa   :  { %vm90_vm1 = vcmp.eq.s32.totalorder %v68_v15, %v2102_v13  ;;  %v1637_v19 = vsel %vm92_vm0, 1.0, %v2000_v18 }
  0xab   :  { %v1635_v20 = vsel %vm90_vm1, 1.0, %v2000_v18 }
  0xac   :  { %v77_v16 = vpop.permute.xlu1 %76 }
  0xad   :  { %v71_v17 = vpop.permute.xlu0 %70  ;;  %vm93_vm2 = vcmp.eq.s32.totalorder %v77_v16, %v2102_v13 }
  0xae   :  { %vm91_vm3 = vcmp.eq.s32.totalorder %v71_v17, %v2102_v13  ;;  %v1638_v21 = vsel %vm93_vm2, 1.0, %v2000_v18  ;;  %v343_v17 = vrot.slane %v334_v11, %v342_v14 }
  0xaf   :  { %v1636_v22 = vsel %vm91_vm3, 1.0, %v2000_v18  ;;  %v115_v23 = vpack.c.bf16 %v1638_v21, %v1637_v19 }
  0xb0   :  { %v114_v24 = vpack.c.bf16 %v1636_v22, %v1635_v20  ;;  %v83_v25 = vpop.permute.xlu1 %82 }
  0xb1   :  { %v80_v26 = vpop.permute.xlu0 %79  ;;  %vm95_vm5 = vcmp.eq.s32.totalorder %v83_v25, %v2102_v13 }
  0xb2   :  { %vm94_vm6 = vcmp.eq.s32.totalorder %v80_v26, %v2102_v13  ;;  %1767 = vmatprep.mubr.msk.bf16.mxu0 %vm126_vm4, %v114_v24  ;;  %v1640_v27 = vsel %vm95_vm5, 1.0, %v2000_v18 }
  0xb3   :  { %v1639_v28 = vsel %vm94_vm6, 1.0, %v2000_v18  ;;  %1768 = vmatmul.mubr.msk.bf16.vlgmr.msra.gmra.mrb[0].mxu0 %vm126_vm4, %v115_v23 }
  0xb4   :  { %v116_v29 = vpack.c.bf16 %v1640_v27, %v1639_v28  ;;  %v89_v30 = vpop.permute.xlu1 %88  ;;  %440 = vmatpush1.bf16.msra.mxu0 %v2120_v37 }
  0xb5   :  { %v86_v31 = vpop.permute.xlu0 %85  ;;  %vm97_vm7 = vcmp.eq.s32.totalorder %v89_v30, %v2102_v13  ;;  %441 = vmatprep.subr.bf16.mxu0 %v2130_v39 }
  0xb6   :  { %vm96_vm8 = vcmp.eq.s32.totalorder %v86_v31, %v2102_v13  ;;  %1771 = vmatprep.mubr.msk.bf16.mxu0 %vm126_vm4, %v116_v29  ;;  %v1642_v32 = vsel %vm97_vm7, 1.0, %v2000_v18 }
  0xb7   :  { %v1641_v33 = vsel %vm96_vm8, 1.0, %v2000_v18 }
  0xb8   :  { %v117_v34 = vpack.c.bf16 %v1642_v32, %v1641_v33  ;;  %442 = vmatpush1.bf16.msra.mxu0 %v2138_v40 }
  0xb9   :  { %443 = vmatprep.subr.bf16.mxu0 %v2150_v42 }
  0xbb   :  { %1772 = vmatmul.mubr.msk.bf16.gmra.mrb[4].mxu0 %vm126_vm4, %v117_v34 }
  0xbc   :  { %471 = vmatprep.mubr.bf16.mxu0 %v1999_v0  ;;  %444 = vmatpush1.bf16.msra.mxu0 %v2145_v41 }
  0xbd   :  { %445 = vmatprep.subr.bf16.mxu0 %v2155_v43 }
  0xc0   :  { %446 = vmatpush1.bf16.msra.mxu0 %v2162_v44 }
  0xc1   :  { %581 = vmatprep.subr.bf16.mxu0 %v2125_v38 }
  0xc3   :  { %472 = vmatmul.mubr.bf16.vlgmr.msra.gmra.mrb[8].mxu0 %v1999_v0 }
  0xc4   :  { %582 = vmatpush1.bf16.msra.mxu0 %v2120_v37  ;;  %613 = vmatprep.mubr.bf16.mxu0 %v1999_v0 }
  0xc5   :  { %583 = vmatprep.subr.bf16.mxu0 %v2130_v39 }
  0xc8   :  { %584 = vmatpush1.bf16.msra.mxu0 %v2138_v40 }
  0xc9   :  { %585 = vmatprep.subr.bf16.mxu0 %v2150_v42 }
  0xcc   :  { %586 = vmatpush1.bf16.msra.mxu0 %v2145_v41 }
  0xcd   :  { %587 = vmatprep.subr.bf16.mxu0 %v2155_v43 }
  0xd0   :  { %588 = vmatpush1.bf16.msra.mxu0 %v2162_v44 }
  0xd1   :  { %865 = vmatprep.subr.bf16.mxu0 %v2125_v38 }
 0x186   :  { %v1769_v45 = vpop.f32.mrb[0].mxu0 }
 0x187   :  { %v173_v46 = vpop.f32.mrb[1].mxu0 }
 0x188   :  { %v1770_v47 = vpop.f32.mrb[2].mxu0 }
 0x189   :  { %v205_v48 = vpack.c.bf16 %v1770_v47, %v1769_v45  ;;  %v176_v49 = vpop.f32.mrb[3].mxu0 }
 0x18a   :  { %v204_v50 = vpack.c.bf16 %v176_v49, %v173_v46 }
 0x18c   :  { %1652 = vmatmul.mubr.msk.bf16.vlgmr.msra.gmra.mrb[0].mxu1 %vm232_vm9, %v204_v50 }
 0x18d   :  { %287 = vmatprep.mubr.bf16.mxu1 %v1999_v0  ;;  %724 = vmatpush1.bf16.msra.mxu1 %v2120_v37 }
 0x18e   :  { %v1773_v51 = vpop.f32.mrb[4].mxu0  ;;  %725 = vmatprep.subr.bf16.mxu1 %v2130_v39 }
 0x18f   :  { %v189_v52 = vpop.f32.mrb[5].mxu0 }
 0x190   :  { %v1774_v53 = vpop.f32.mrb[6].mxu0 }
 0x191   :  { %v207_v54 = vpack.c.bf16 %v1774_v53, %v1773_v51  ;;  %v192_v55 = vpop.f32.mrb[7].mxu0  ;;  %726 = vmatpush1.bf16.msra.mxu1 %v2138_v40 }
 0x192   :  { %v206_v56 = vpack.c.bf16 %v192_v55, %v189_v52  ;;  %727 = vmatprep.subr.bf16.mxu1 %v2150_v42 }
 0x194   :  { %1653 = vmatmul.mubr.msk.bf16.gmra.mrb[4].mxu1 %vm232_vm9, %v205_v48 }
 0x195   :  { %297 = vmatprep.mubr.bf16.mxu1 %v1999_v0  ;;  %728 = vmatpush1.bf16.msra.mxu1 %v2145_v41 }
 0x196   :  { %729 = vmatprep.subr.bf16.mxu1 %v2155_v43  ;;  %v2193_v57 = vpop.f32.mrb[8].mxu0 }
 0x197   :  { %v2195_v58 = vpop.f32.mrb[9].mxu0 }
 0x198   :  { %v477_v59 = vpop.f32.mrb[10].mxu0 }
 0x199   :  { %730 = vmatpush1.bf16.msra.mxu1 %v2162_v44  ;;  %v478_v60 = vpop.f32.mrb[11].mxu0 }
 0x19a   :  { %1001 = vmatprep.subr.bf16.mxu1 %v2125_v38 }
 0x19c   :  { %1654 = vmatmul.mubr.msk.bf16.gmra.mrb[8].mxu1 %vm232_vm9, %v206_v56 }
 0x19d   :  { %307 = vmatprep.mubr.bf16.mxu1 %v1999_v0 }
 0x1a4   :  { %1655 = vmatmul.mubr.msk.bf16.gmra.mrb[12].mxu1 %vm232_vm9, %v207_v54 }
 0x1a5   :  { %755 = vmatprep.mubr.bf16.mxu1 %v1999_v0 }
 0x25f   :  { %v279_v61 = vpop.f32.mrb[0].mxu1 }
 0x260   :  { %v281_v62 = vpop.f32.mrb[1].mxu1 }
 0x261   :  { %v283_v63 = vpop.f32.mrb[2].mxu1 }
 0x262   :  { %v285_v1 = vpop.f32.mrb[3].mxu1 }
 0x267   :  { %v289_v4 = vpop.f32.mrb[4].mxu1 }
 0x268   :  { %v291_v5 = vpop.f32.mrb[5].mxu1 }
 0x269   :  { %v293_v6 = vpop.f32.mrb[6].mxu1 }
 0x26a   :  { %v295_v9 = vpop.f32.mrb[7].mxu1 }
 0x26f   :  { %v299_v18 = vpop.f32.mrb[8].mxu1 }
 0x270   :  { %v807_v13 = vsel %vm2203_vm10, %v293_v6, %v299_v18  ;;  %v943_v19 = vsel %vm2203_vm10, %v299_v18, %v293_v6  ;;  %v301_v20 = vpop.f32.mrb[9].mxu1 }
 0x271   :  { %v808_v21 = vsel %vm2207_vm11, %v295_v9, %v301_v20  ;;  %v944_v22 = vsel %vm2207_vm11, %v301_v20, %v295_v9  ;;  %v303_v23 = vpop.f32.mrb[10].mxu1  ;;  %v2219_v24 = vadd.f32 %v807_v13, %v339_v12  ;;  %v2221_v25 = vadd.f32 %v943_v19, %v339_v12 }
 0x272   :  { %v665_v26 = vsel %vm2203_vm10, %v289_v4, %v303_v23  ;;  %v1077_v27 = vsel %vm2203_vm10, %v303_v23, %v289_v4  ;;  %v305_v28 = vpop.f32.mrb[11].mxu1  ;;  %v2227_v29 = vadd.f32 %v808_v21, %v343_v17  ;;  %v2229_v30 = vadd.f32 %v944_v22, %v343_v17 }
 0x273   :  { %v666_v31 = vsel %vm2207_vm11, %v291_v5, %v305_v28  ;;  %v1078_v32 = vsel %vm2207_vm11, %v305_v28, %v291_v5  ;;  %v2235_v33 = vadd.f32 %v665_v26, %v339_v12  ;;  %v2237_v34 = vadd.f32 %v1077_v27, %v339_v12 }
 0x274   :  { %v2239_v35 = vadd.f32 %v666_v31, %v343_v17  ;;  %v2241_v36 = vadd.f32 %v1078_v32, %v343_v17 }
 0x277   :  { %v309_v45 = vpop.f32.mrb[12].mxu1 }
 0x278   :  { %v523_v46 = vsel %vm2203_vm10, %v283_v63, %v309_v45  ;;  %v1211_v47 = vsel %vm2203_vm10, %v309_v45, %v283_v63  ;;  %v311_v48 = vpop.f32.mrb[13].mxu1 }
 0x279   :  { %v524_v49 = vsel %vm2207_vm11, %v285_v1, %v311_v48  ;;  %v1212_v50 = vsel %vm2207_vm11, %v311_v48, %v285_v1  ;;  %v313_v51 = vpop.f32.mrb[14].mxu1  ;;  %v525_v52 = vadd.f32 %v523_v46, %v339_v12  ;;  %v2251_v53 = vadd.f32 %v1211_v47, %v339_v12 }
 0x27a   :  { %v383_v54 = vsel %vm2203_vm10, %v279_v61, %v313_v51  ;;  %v1345_v55 = vsel %vm2203_vm10, %v313_v51, %v279_v61  ;;  %v315_v56 = vpop.f32.mrb[15].mxu1  ;;  %v526_v59 = vadd.f32 %v524_v49, %v343_v17  ;;  %v2257_v60 = vadd.f32 %v1212_v50, %v343_v17 }
 0x27b   :  { %v385_v63 = vadd.f32 %v383_v54, %v339_v12  ;;  %v384_v2 = vsel %vm2207_vm11, %v281_v62, %v315_v56  ;;  %v1346_v1 = vsel %vm2207_vm11, %v315_v56, %v281_v62  ;;  %v2263_v3 = vadd.f32 %v1345_v55, %v339_v12 }
 0x27c   :  { %v386_v4 = vadd.f32 %v384_v2, %v343_v17  ;;  %v2265_v5 = vadd.f32 %v1346_v1, %v343_v17 }
 0x27d   :  { %v480_v6 = vadd.f32 %v2193_v57, %v385_v63 }
 0x27e   :  { %v481_v61 = vadd.f32 %v2195_v58, %v386_v4 }
 0x27f   :  { %v1664_v7 = vmul.f32 -1.442695, %v480_v6 }
 0x280   :  { %v1665_v62 = vmul.f32 -1.442695, %v481_v61 }
 0x281   :  { %1825 = vpow2.f32 %v1664_v7 }
 0x282   :  { %1827 = vtanh.f32 %v481_v61 }
 0x28b   :  { %v1826_v8 = vpop.eup %1825 }
 0x28c   :  { %v488_v9 = vadd.f32 1.0, %v1826_v8  ;;  %v1828_v10 = vpop.eup %1827 }
 0x28e   :  { %1829 = vrcp.f32 %v488_v9 }
 0x28f   :  { %1831 = vpow2.f32 %v1665_v62 }
 0x298   :  { %v1830_v11 = vpop.eup %1829 }
 0x299   :  { %v496_v14 = vmul.f32 %v1830_v11, %v1828_v10  ;;  %v1832_v15 = vpop.eup %1831  ;;  %v495_v16 = vmul.f32 0.0, %v1830_v11 }
 0x29a   :  { %v489_v12 = vadd.f32 1.0, %v1832_v15 }
 0x29b   :  { %498 = vrot.lane.b32.xlu0 %v496_v14, %s1997_s2 }
 0x29c   :  { %1833 = vrcp.f32 %v489_v12 }
 0x2a6   :  { %v1834_v58 = vpop.eup %1833 }
 0x30d   :  { %v499_v17 = vpop.permute.xlu0 %498 }
 0x30e   :  { %v501_v57 = vadd.f32 %v499_v17, %v495_v16 }
 0x310   :  { %1835 = vtanh.f32 %v501_v57 }
 0x31a   :  { %v1836_v18 = vpop.eup %1835 }
 0x31b   :  { %v2270_v13 = vmul.f32 %v1836_v18, %v1834_v58 }
 0x31d   :  { %v512_v19 = vpack.c.bf16 %v2270_v13, %v2270_v13 }
 0x31f   :  { %536 = vrot.lane.b32.xlu1 %v512_v19, %s1997_s2 }
 0x391   :  { %v537_v20 = vpop.permute.xlu1 %536 }
 0x392   :  { %1674 = vmatmul.mubr.msk.bf16.vlgmr.msra.gmra.mrb[12].mxu0 %vm435_vm12, %v537_v20 }
 0x393   :  { %866 = vmatpush1.bf16.msra.mxu0 %v2120_v37  ;;  %897 = vmatprep.mubr.bf16.mxu0 %v1999_v0 }
 0x394   :  { %867 = vmatprep.subr.bf16.mxu0 %v2130_v39 }
 0x397   :  { %868 = vmatpush1.bf16.msra.mxu0 %v2138_v40 }
 0x398   :  { %869 = vmatprep.subr.bf16.mxu0 %v2150_v42 }
 0x39b   :  { %870 = vmatpush1.bf16.msra.mxu0 %v2145_v41 }
 0x39c   :  { %871 = vmatprep.subr.bf16.mxu0 %v2155_v43 }
 0x39f   :  { %872 = vmatpush1.bf16.msra.mxu0 %v2162_v44 }
 0x3a0   :  { %1135 = vmatprep.subr.bf16.mxu0 %v2125_v38 }
 0x465   :  { %v615_v21 = vpop.f32.mrb[12].mxu0 }
 0x466   :  { %v622_v22 = vadd.f32 %v615_v21, %v525_v52  ;;  %v617_v23 = vpop.f32.mrb[13].mxu0 }
 0x467   :  { %v623_v26 = vadd.f32 %v617_v23, %v526_v59  ;;  %v619_v27 = vpop.f32.mrb[14].mxu0 }
 0x468   :  { %v1675_v28 = vmul.f32 -1.442695, %v622_v22  ;;  %v620_v31 = vpop.f32.mrb[15].mxu0 }
 0x469   :  { %v1676_v49 = vmul.f32 -1.442695, %v623_v26 }
 0x46a   :  { %1837 = vpow2.f32 %v1675_v28 }
 0x46b   :  { %1839 = vtanh.f32 %v623_v26 }
 0x474   :  { %v1838_v32 = vpop.eup %1837 }
 0x475   :  { %v630_v45 = vadd.f32 1.0, %v1838_v32  ;;  %v1840_v46 = vpop.eup %1839 }
 0x477   :  { %1841 = vrcp.f32 %v630_v45 }
 0x478   :  { %1843 = vpow2.f32 %v1676_v49 }
 0x481   :  { %v1842_v47 = vpop.eup %1841 }
 0x482   :  { %v638_v48 = vmul.f32 %v1842_v47, %v1840_v46  ;;  %v1844_v50 = vpop.eup %1843  ;;  %v637_v52 = vmul.f32 %v1842_v47, %v501_v57 }
 0x483   :  { %v631_v51 = vadd.f32 1.0, %v1844_v50 }
 0x484   :  { %640 = vrot.lane.b32.xlu0 %v638_v48, %s1997_s2 }
 0x485   :  { %1845 = vrcp.f32 %v631_v51 }
 0x48f   :  { %v1846_v56 = vpop.eup %1845 }
 0x4f6   :  { %v641_v54 = vpop.permute.xlu0 %640 }
 0x4f7   :  { %v643_v55 = vadd.f32 %v641_v54, %v637_v52 }
 0x4f9   :  { %1847 = vtanh.f32 %v643_v55 }
 0x503   :  { %v1848_v59 = vpop.eup %1847 }
 0x504   :  { %v2286_v63 = vmul.f32 %v1848_v59, %v1846_v56 }
 0x506   :  { %v654_v2 = vpack.c.bf16 %v2286_v63, %v2286_v63 }
 0x508   :  { %678 = vrot.lane.b32.xlu1 %v654_v2, %s1997_s2 }
 0x57a   :  { %v679_v1 = vpop.permute.xlu1 %678 }
 0x57b   :  { %1685 = vmatmul.mubr.msk.bf16.vlgmr.msra.gmra.mrb[16].mxu1 %vm435_vm12, %v679_v1 }
 0x57c   :  { %1002 = vmatpush1.bf16.msra.mxu1 %v2120_v37  ;;  %1033 = vmatprep.mubr.bf16.mxu1 %v1999_v0 }
 0x57d   :  { %1003 = vmatprep.subr.bf16.mxu1 %v2130_v39 }
 0x580   :  { %1004 = vmatpush1.bf16.msra.mxu1 %v2138_v40 }
 0x581   :  { %1005 = vmatprep.subr.bf16.mxu1 %v2150_v42 }
 0x584   :  { %1006 = vmatpush1.bf16.msra.mxu1 %v2145_v41 }
 0x585   :  { %1007 = vmatprep.subr.bf16.mxu1 %v2155_v43 }
 0x588   :  { %1008 = vmatpush1.bf16.msra.mxu1 %v2162_v44 }
 0x589   :  { %1269 = vmatprep.subr.bf16.mxu1 %v2125_v38 }
 0x64e   :  { %v757_v4 = vpop.f32.mrb[16].mxu1 }
 0x64f   :  { %v764_v6 = vadd.f32 %v757_v4, %v2235_v33  ;;  %v759_v61 = vpop.f32.mrb[17].mxu1 }
 0x650   :  { %v765_v7 = vadd.f32 %v759_v61, %v2239_v35  ;;  %v761_v8 = vpop.f32.mrb[18].mxu1 }
 0x651   :  { %v1686_v9 = vmul.f32 -1.442695, %v764_v6  ;;  %v762_v10 = vpop.f32.mrb[19].mxu1 }
 0x652   :  { %v1687_v16 = vmul.f32 -1.442695, %v765_v7 }
 0x653   :  { %1849 = vpow2.f32 %v1686_v9 }
 0x654   :  { %1851 = vtanh.f32 %v765_v7 }
 0x65d   :  { %v1850_v11 = vpop.eup %1849 }
 0x65e   :  { %v772_v14 = vadd.f32 1.0, %v1850_v11  ;;  %v1852_v62 = vpop.eup %1851 }
 0x660   :  { %1853 = vrcp.f32 %v772_v14 }
 0x661   :  { %1855 = vpow2.f32 %v1687_v16 }
 0x66a   :  { %v1854_v15 = vpop.eup %1853 }
 0x66b   :  { %v780_v12 = vmul.f32 %v1854_v15, %v1852_v62  ;;  %v1856_v17 = vpop.eup %1855  ;;  %v779_v57 = vmul.f32 %v1854_v15, %v643_v55 }
 0x66c   :  { %v773_v33 = vadd.f32 1.0, %v1856_v17 }
 0x66d   :  { %782 = vrot.lane.b32.xlu0 %v780_v12, %s1997_s2 }
 0x66e   :  { %1857 = vrcp.f32 %v773_v33 }
 0x678   :  { %v1858_v18 = vpop.eup %1857 }
 0x6df   :  { %v783_v58 = vpop.permute.xlu0 %782 }
 0x6e0   :  { %v785_v35 = vadd.f32 %v783_v58, %v779_v57 }
 0x6e2   :  { %1859 = vtanh.f32 %v785_v35 }
 0x6ec   :  { %v1860_v19 = vpop.eup %1859 }
 0x6ed   :  { %v2304_v20 = vmul.f32 %v1860_v19, %v1858_v18 }
 0x6ef   :  { %v796_v21 = vpack.c.bf16 %v2304_v20, %v2304_v20 }
 0x6f1   :  { %820 = vrot.lane.b32.xlu1 %v796_v21, %s1997_s2 }
 0x763   :  { %v821_v22 = vpop.permute.xlu1 %820 }
 0x764   :  { %1696 = vmatmul.mubr.msk.bf16.vlgmr.msra.gmra.mrb[16].mxu0 %vm435_vm12, %v821_v22 }
 0x765   :  { %1136 = vmatpush1.bf16.msra.mxu0 %v2120_v37  ;;  %1167 = vmatprep.mubr.bf16.mxu0 %v1999_v0 }
 0x766   :  { %1137 = vmatprep.subr.bf16.mxu0 %v2130_v39 }
 0x769   :  { %1138 = vmatpush1.bf16.msra.mxu0 %v2138_v40 }
 0x76a   :  { %1139 = vmatprep.subr.bf16.mxu0 %v2150_v42 }
 0x76d   :  { %1140 = vmatpush1.bf16.msra.mxu0 %v2145_v41 }
 0x76e   :  { %1141 = vmatprep.subr.bf16.mxu0 %v2155_v43 }
 0x771   :  { %1142 = vmatpush1.bf16.msra.mxu0 %v2162_v44 }
 0x772   :  { %1403 = vmatprep.subr.bf16.mxu0 %v2125_v38 }
 0x837   :  { %v899_v23 = vpop.f32.mrb[16].mxu0 }
 0x838   :  { %v906_v26 = vadd.f32 %v899_v23, %v2219_v24  ;;  %v901_v27 = vpop.f32.mrb[17].mxu0 }
 0x839   :  { %v907_v28 = vadd.f32 %v901_v27, %v2227_v29  ;;  %v903_v31 = vpop.f32.mrb[18].mxu0 }
 0x83a   :  { %v1697_v32 = vmul.f32 -1.442695, %v906_v26  ;;  %v904_v45 = vpop.f32.mrb[19].mxu0 }
 0x83b   :  { %v1698_v38 = vmul.f32 -1.442695, %v907_v28 }
 0x83c   :  { %1861 = vpow2.f32 %v1697_v32 }
 0x83d   :  { %1863 = vtanh.f32 %v907_v28 }
 0x846   :  { %v1862_v46 = vpop.eup %1861 }
 0x847   :  { %v914_v47 = vadd.f32 1.0, %v1862_v46  ;;  %v1864_v48 = vpop.eup %1863 }
 0x849   :  { %1865 = vrcp.f32 %v914_v47 }
 0x84a   :  { %1867 = vpow2.f32 %v1698_v38 }
 0x853   :  { %v1866_v49 = vpop.eup %1865 }
 0x854   :  { %v922_v50 = vmul.f32 %v1866_v49, %v1864_v48  ;;  %v1868_v51 = vpop.eup %1867  ;;  %v921_v52 = vmul.f32 %v1866_v49, %v785_v35 }
 0x855   :  { %v915_v24 = vadd.f32 1.0, %v1868_v51 }
 0x856   :  { %924 = vrot.lane.b32.xlu0 %v922_v50, %s1997_s2 }
 0x857   :  { %1869 = vrcp.f32 %v915_v24 }
 0x861   :  { %v1870_v55 = vpop.eup %1869 }
 0x8c8   :  { %v925_v54 = vpop.permute.xlu0 %924 }
 0x8c9   :  { %v927_v29 = vadd.f32 %v925_v54, %v921_v52 }
 0x8cb   :  { %1871 = vtanh.f32 %v927_v29 }
 0x8d5   :  { %v1872_v56 = vpop.eup %1871 }
 0x8d6   :  { %v2322_v59 = vmul.f32 %v1872_v56, %v1870_v55 }
 0x8d8   :  { %v938_v2 = vpack.c.bf16 %v2322_v59, %v2322_v59 }
 0x8da   :  { %956 = vrot.lane.b32.xlu1 %v938_v2, %s1997_s2 }
 0x94c   :  { %v957_v1 = vpop.permute.xlu1 %956 }
 0x94d   :  { %1707 = vmatmul.mubr.msk.bf16.vlgmr.msra.gmra.mrb[20].mxu1 %vm435_vm12, %v957_v1 }
 0x94e   :  { %1270 = vmatpush1.bf16.msra.mxu1 %v2120_v37  ;;  %1301 = vmatprep.mubr.bf16.mxu1 %v1999_v0 }
 0x94f   :  { %1271 = vmatprep.subr.bf16.mxu1 %v2130_v39 }
 0x952   :  { %1272 = vmatpush1.bf16.msra.mxu1 %v2138_v40 }
 0x953   :  { %1273 = vmatprep.subr.bf16.mxu1 %v2150_v42 }
 0x956   :  { %1274 = vmatpush1.bf16.msra.mxu1 %v2145_v41 }
 0x957   :  { %1275 = vmatprep.subr.bf16.mxu1 %v2155_v43 }
 0x95a   :  { %1276 = vmatpush1.bf16.msra.mxu1 %v2162_v44 }
 0xa20   :  { %v1035_v4 = vpop.f32.mrb[20].mxu1 }
 0xa21   :  { %v1042_v6 = vadd.f32 %v1035_v4, %v2221_v25  ;;  %v1037_v61 = vpop.f32.mrb[21].mxu1 }
 0xa22   :  { %v1043_v7 = vadd.f32 %v1037_v61, %v2229_v30  ;;  %v1039_v8 = vpop.f32.mrb[22].mxu1 }
 0xa23   :  { %v1708_v9 = vmul.f32 -1.442695, %v1042_v6  ;;  %v1040_v10 = vpop.f32.mrb[23].mxu1 }
 0xa24   :  { %v1709_v16 = vmul.f32 -1.442695, %v1043_v7 }
 0xa25   :  { %1873 = vpow2.f32 %v1708_v9 }
 0xa26   :  { %1875 = vtanh.f32 %v1043_v7 }
 0xa2f   :  { %v1874_v11 = vpop.eup %1873 }
 0xa30   :  { %v1050_v14 = vadd.f32 1.0, %v1874_v11  ;;  %v1876_v62 = vpop.eup %1875 }
 0xa32   :  { %1877 = vrcp.f32 %v1050_v14 }
 0xa33   :  { %1879 = vpow2.f32 %v1709_v16 }
 0xa3c   :  { %v1878_v15 = vpop.eup %1877 }
 0xa3d   :  { %v1058_v12 = vmul.f32 %v1878_v15, %v1876_v62  ;;  %v1880_v17 = vpop.eup %1879  ;;  %v1057_v33 = vmul.f32 %v1878_v15, %v927_v29 }
 0xa3e   :  { %v1051_v25 = vadd.f32 1.0, %v1880_v17 }
 0xa3f   :  { %1060 = vrot.lane.b32.xlu0 %v1058_v12, %s1997_s2 }
 0xa40   :  { %1881 = vrcp.f32 %v1051_v25 }
 0xa4a   :  { %v1882_v58 = vpop.eup %1881 }
 0xab1   :  { %v1061_v57 = vpop.permute.xlu0 %1060 }
 0xab2   :  { %v1063_v30 = vadd.f32 %v1061_v57, %v1057_v33 }
 0xab4   :  { %1883 = vtanh.f32 %v1063_v30 }
 0xabe   :  { %v1884_v35 = vpop.eup %1883 }
 0xabf   :  { %v2339_v18 = vmul.f32 %v1884_v35, %v1882_v58 }
 0xac1   :  { %v1072_v19 = vpack.c.bf16 %v2339_v18, %v2339_v18 }
 0xac3   :  { %1090 = vrot.lane.b32.xlu1 %v1072_v19, %s1997_s2 }
 0xb35   :  { %v1091_v21 = vpop.permute.xlu1 %1090 }
 0xb36   :  { %1718 = vmatmul.mubr.msk.bf16.vlgmr.msra.gmra.mrb[20].mxu0 %vm435_vm12, %v1091_v21 }
 0xb37   :  { %1404 = vmatpush1.bf16.msra.mxu0 %v2120_v37  ;;  %1435 = vmatprep.mubr.bf16.mxu0 %v1999_v0 }
 0xb38   :  { %1405 = vmatprep.subr.bf16.mxu0 %v2130_v39 }
 0xb3b   :  { %1406 = vmatpush1.bf16.msra.mxu0 %v2138_v40 }
 0xb3c   :  { %1407 = vmatprep.subr.bf16.mxu0 %v2150_v42 }
 0xb3f   :  { %1408 = vmatpush1.bf16.msra.mxu0 %v2145_v41 }
 0xb40   :  { %1409 = vmatprep.subr.bf16.mxu0 %v2155_v43 }
 0xb43   :  { %1410 = vmatpush1.bf16.msra.mxu0 %v2162_v44 }
 0xc09   :  { %v1169_v22 = vpop.f32.mrb[20].mxu0 }
 0xc0a   :  { %v1176_v23 = vadd.f32 %v1169_v22, %v2237_v34  ;;  %v1171_v26 = vpop.f32.mrb[21].mxu0 }
 0xc0b   :  { %v1177_v37 = vadd.f32 %v1171_v26, %v2241_v36  ;;  %v1173_v27 = vpop.f32.mrb[22].mxu0 }
 0xc0c   :  { %v1719_v0 = vmul.f32 -1.442695, %v1176_v23  ;;  %v1174_v28 = vpop.f32.mrb[23].mxu0 }
 0xc0d   :  { %v1720_v43 = vmul.f32 -1.442695, %v1177_v37  ;;  %v1822_v28 = vld [vmem:[#allocation7 + $0x8] sm:$0xff]  }
 0xc0e   :  { %1885 = vpow2.f32 %v1719_v0 }
 0xc0f   :  { %1887 = vtanh.f32 %v1177_v37 }
 0xc18   :  { %v1886_v39 = vpop.eup %1885 }
 0xc19   :  { %v1184_v40 = vadd.f32 1.0, %v1886_v39  ;;  %v1888_v42 = vpop.eup %1887 }
 0xc1b   :  { %1889 = vrcp.f32 %v1184_v40 }
 0xc1c   :  { %1891 = vpow2.f32 %v1720_v43 }
 0xc25   :  { %v1890_v41 = vpop.eup %1889 }
 0xc26   :  { %v1192_v31 = vmul.f32 %v1890_v41, %v1888_v42  ;;  %v1892_v44 = vpop.eup %1891  ;;  %v1191_v32 = vmul.f32 %v1890_v41, %v1063_v30 }
 0xc27   :  { %v1185_v34 = vadd.f32 1.0, %v1892_v44 }
 0xc28   :  { %1194 = vrot.lane.b32.xlu0 %v1192_v31, %s1997_s2 }
 0xc29   :  { %1893 = vrcp.f32 %v1185_v34 }
 0xc33   :  { %v1894_v46 = vpop.eup %1893 }
 0xc9a   :  { %v1195_v45 = vpop.permute.xlu0 %1194 }
 0xc9b   :  { %v1197_v36 = vadd.f32 %v1195_v45, %v1191_v32 }
 0xc9d   :  { %1895 = vtanh.f32 %v1197_v36 }
 0xca7   :  { %v1896_v47 = vpop.eup %1895 }
 0xca8   :  { %v2356_v48 = vmul.f32 %v1896_v47, %v1894_v46 }
 0xcaa   :  { %v1206_v49 = vpack.c.bf16 %v2356_v48, %v2356_v48 }
 0xcac   :  { %1224 = vrot.lane.b32.xlu1 %v1206_v49, %s1997_s2 }
 0xd1e   :  { %v1225_v50 = vpop.permute.xlu1 %1224 }
 0xd1f   :  { %1729 = vmatmul.mubr.msk.bf16.vlgmr.msra.gmra.mrb[24].mxu1 %vm435_vm12, %v1225_v50 }
 0xdf2   :  { %v1303_v38 = vpop.f32.mrb[24].mxu1 }
 0xdf3   :  { %v1310_v51 = vadd.f32 %v1303_v38, %v2251_v53  ;;  %v1305_v24 = vpop.f32.mrb[25].mxu1 }
 0xdf4   :  { %v1311_v52 = vadd.f32 %v1305_v24, %v2257_v60  ;;  %v1307_v54 = vpop.f32.mrb[26].mxu1 }
 0xdf5   :  { %v1730_v29 = vmul.f32 -1.442695, %v1310_v51  ;;  %v1308_v55 = vpop.f32.mrb[27].mxu1  ;;  %v1743_v54 = vld [vmem:[%s2428_s6] ss:$0 sm:$0xff]  ;;  %s1965_s6 = scalar_lea.vmem %s1616_s18, 1024 }
 0xdf6   :  { %v1731_v61 = vmul.f32 -1.442695, %v1311_v52  ;;  %p1966_p2 = scmp.ne.s32.totalorder %s1616_s18, %s1965_s6  ;;  %p1971_p4 = scmp.lt.s32.totalorder %s1965_s6, %s1965_s6 }
 0xdf7   :  { %1897 = vpow2.f32 %v1730_v29 }
 0xdf8   :  { %1899 = vtanh.f32 %v1311_v52  ;;  %p1972_p5 = por %p1971_p4, %p1970_p3 }
 0xdfa   :  { %p1973_p6 = pnand %p1972_p5, %p1966_p2 }
 0xe01   :  { %v1898_v56 = vpop.eup %1897 }
 0xe02   :  { %v1318_v2 = vadd.f32 1.0, %v1898_v56  ;;  %v1900_v1 = vpop.eup %1899 }
 0xe04   :  { %1901 = vrcp.f32 %v1318_v2 }
 0xe05   :  { %1903 = vpow2.f32 %v1731_v61 }
 0xe0e   :  { %v1902_v4 = vpop.eup %1901 }
 0xe0f   :  { %v1326_v6 = vmul.f32 %v1902_v4, %v1900_v1  ;;  %v1904_v7 = vpop.eup %1903  ;;  %v1325_v8 = vmul.f32 %v1902_v4, %v1197_v36 }
 0xe10   :  { %v1319_v53 = vadd.f32 1.0, %v1904_v7 }
 0xe11   :  { %1328 = vrot.lane.b32.xlu0 %v1326_v6, %s1997_s2 }
 0xe12   :  { %1905 = vrcp.f32 %v1319_v53 }
 0xe1c   :  { %v1906_v10 = vpop.eup %1905 }
 0xe83   :  { %v1329_v9 = vpop.permute.xlu0 %1328 }
 0xe84   :  { %v1331_v60 = vadd.f32 %v1329_v9, %v1325_v8 }
 0xe86   :  { %1907 = vtanh.f32 %v1331_v60 }
 0xe90   :  { %v1908_v11 = vpop.eup %1907 }
 0xe91   :  { %v1333_v14 = vmul.f32 %v1908_v11, %v1906_v10 }
 0xe93   :  { %v1340_v62 = vpack.c.bf16 %v1333_v14, %v1333_v14 }
 0xe95   :  { %1358 = vrot.lane.b32.xlu1 %v1340_v62, %s1997_s2 }
 0xe99   :  { %505 = vrot.lane.b32.xlu1 %v2270_v13, %s1997_s2 }
 0xe9d   :  { %789 = vrot.lane.b32.xlu1 %v2304_v20, %s1997_s2 }
 0xea1   :  { %1335 = vrot.lane.b32.xlu1 %v1333_v14, %s1997_s2 }
 0xea5   :  { %1067 = vrot.lane.b32.xlu1 %v2339_v18, %s1997_s2 }
 0xf07   :  { %v1359_v15 = vpop.permute.xlu1 %1358 }
 0xf08   :  { %1740 = vmatmul.mubr.msk.bf16.vlgmr.msra.gmra.mrb[24].mxu0 %vm435_vm12, %v1359_v15 }
 0xf0b   :  { %v506_v12 = vpop.permute.xlu1 %505 }
 0xf0c   :  { %508 = vst.msk [vmem:[#allocation3] sm:$0xff] %vm232_vm9, %v506_v12 }
 0xf0d   :  { %511 = vst.msk [vmem:[#allocation3 + $0x38] sm:$0xff] %vm510_vm13, %v506_v12 }
 0xf0f   :  { %v790_v16 = vpop.permute.xlu1 %789 }
 0xf10   :  { %793 = vst.msk [vmem:[#allocation3 + $0x10] sm:$0xff] %vm232_vm9, %v790_v16 }
 0xf11   :  { %795 = vst.msk [vmem:[#allocation3 + $0x28] sm:$0xff] %vm510_vm13, %v790_v16 }
 0xf13   :  { %v1336_v0 = vpop.permute.xlu1 %1335 }
 0xf17   :  { %v1068_v42 = vpop.permute.xlu1 %1067 }
 0xfdb   :  { %v1437_v13 = vpop.f32.mrb[24].mxu0 }
 0xfdc   :  { %v1444_v20 = vadd.f32 %v1437_v13, %v2263_v3  ;;  %v1439_v17 = vpop.f32.mrb[25].mxu0  ;;  %v1821_v3 = vld [vmem:[#allocation7] sm:$0xff]  }
 0xfdd   :  { %v1445_v25 = vadd.f32 %v1439_v17, %v2265_v5  ;;  %v1441_v33 = vpop.f32.mrb[26].mxu0  ;;  %1775 = vmatprep.subr.bf16.mxu1 %v1821_v3 }
 0xfde   :  { %v1741_v57 = vmul.f32 -1.442695, %v1444_v20  ;;  %v1442_v30 = vpop.f32.mrb[27].mxu0  ;;  %1776 = vmatpush3.bf16.msra.mxu1 %v1821_v3 }
 0xfdf   :  { %v1742_v5 = vmul.f32 -1.442695, %v1445_v25  ;;  %1777 = vmatprep.subr.bf16.mxu1 %v1822_v28 }
 0xfe0   :  { %1909 = vpow2.f32 %v1741_v57 }
 0xfe1   :  { %1911 = vtanh.f32 %v1445_v25 }
 0xfe2   :  { %1778 = vmatpush3.bf16.msra.mxu1 %v1822_v28 }
 0xfea   :  { %v1910_v58 = vpop.eup %1909 }
 0xfeb   :  { %v1452_v35 = vadd.f32 1.0, %v1910_v58  ;;  %v1912_v18 = vpop.eup %1911 }
 0xfed   :  { %1913 = vrcp.f32 %v1452_v35 }
 0xfee   :  { %1915 = vpow2.f32 %v1742_v5 }
 0xff7   :  { %v1914_v19 = vpop.eup %1913 }
 0xff8   :  { %v1460_v21 = vmul.f32 %v1914_v19, %v1912_v18  ;;  %v1916_v22 = vpop.eup %1915  ;;  %v1459_v26 = vmul.f32 %v1914_v19, %v1331_v60 }
 0xff9   :  { %v1453_v23 = vadd.f32 1.0, %v1916_v22 }
 0xffa   :  { %1462 = vrot.lane.b32.xlu0 %v1460_v21, %s1997_s2 }
 0xffb   :  { %1917 = vrcp.f32 %v1453_v23 }
 0xffe   :  { %647 = vrot.lane.b32.xlu0 %v2286_v63, %s1997_s2  ;;  %v1823_v63 = vld [vmem:[#allocation7 + $0x10] sm:$0xff]  }
 0xfff   :  { %1779 = vmatprep.subr.bf16.mxu1 %v1823_v63 }
0x1000   :  { %1780 = vmatpush3.bf16.msra.mxu1 %v1823_v63 }
0x1002   :  { %931 = vrot.lane.b32.xlu0 %v2322_v59, %s1997_s2  ;;  %v1824_v59 = vld [vmem:[#allocation7 + $0x18] sm:$0xff]  }
0x1003   :  { %1781 = vmatprep.subr.bf16.mxu1 %v1824_v59 }
0x1004   :  { %1782 = vmatpush3.bf16.msra.mxu1 %v1824_v59 }
0x1005   :  { %v1918_v41 = vpop.eup %1917 }
0x106c   :  { %v1463_v37 = vpop.permute.xlu0 %1462 }
0x106d   :  { %v1465_v27 = vadd.f32 %v1463_v37, %v1459_v26 }
0x106f   :  { %1919 = vtanh.f32 %v1465_v27 }
0x1070   :  { %v648_v39 = vpop.permute.xlu0 %647 }
0x1071   :  { %651 = vst.msk [vmem:[#allocation3 + $0x8] sm:$0xff] %vm232_vm9, %v648_v39 }
0x1072   :  { %653 = vst.msk [vmem:[#allocation3 + $0x30] sm:$0xff] %vm510_vm13, %v648_v39  ;;  %1339 = vst.msk [vmem:[#allocation3 + $0x8] sm:$0xff] %vm510_vm13, %v1336_v0 }
0x1073   :  { %1338 = vst.msk [vmem:[#allocation3 + $0x30] sm:$0xff] %vm232_vm9, %v1336_v0 }
0x1074   :  { %v932_v40 = vpop.permute.xlu0 %931 }
0x1075   :  { %935 = vst.msk [vmem:[#allocation3 + $0x18] sm:$0xff] %vm232_vm9, %v932_v40 }
0x1076   :  { %937 = vst.msk [vmem:[#allocation3 + $0x20] sm:$0xff] %vm510_vm13, %v932_v40  ;;  %1071 = vst.msk [vmem:[#allocation3 + $0x18] sm:$0xff] %vm510_vm13, %v1068_v42 }
0x1077   :  { %1070 = vst.msk [vmem:[#allocation3 + $0x20] sm:$0xff] %vm232_vm9, %v1068_v42 }
0x1079   :  { %v1920_v31 = vpop.eup %1919  ;;  %v1475_v45 = vld [vmem:[#allocation3 + $0x8] sm:$0xff] }
0x107a   :  { %v1467_v43 = vmul.f32 %v1920_v31, %v1918_v41  ;;  %v1480_v24 = vld [vmem:[#allocation3 + $0x30] sm:$0xff] }
0x107c   :  { %1469 = vrot.lane.b32.xlu0 %v1467_v43, %s1997_s2 }
0x107d   :  { %v1477_v46 = vld [vmem:[#allocation3 + $0x18] sm:$0xff] }
0x107e   :  { %v1478_v49 = vld [vmem:[#allocation3 + $0x20] sm:$0xff] }
0x1080   :  { %1201 = vrot.lane.b32.xlu0 %v2356_v48, %s1997_s2 }
0x10ee   :  { %v1470_v44 = vpop.permute.xlu0 %1469 }
0x10ef   :  { %1472 = vst.msk [vmem:[#allocation3 + $0x38] sm:$0xff] %vm232_vm9, %v1470_v44 }
0x10f0   :  { %1473 = vst.msk [vmem:[#allocation3] sm:$0xff] %vm510_vm13, %v1470_v44 }
0x10f2   :  { %v1202_v34 = vpop.permute.xlu0 %1201 }
0x10f3   :  { %1204 = vst.msk [vmem:[#allocation3 + $0x28] sm:$0xff] %vm232_vm9, %v1202_v34 }
0x10f4   :  { %1205 = vst.msk [vmem:[#allocation3 + $0x10] sm:$0xff] %vm510_vm13, %v1202_v34 }
0x10f6   :  { %v1481_v51 = vld [vmem:[#allocation3 + $0x38] sm:$0xff] }
0x10f7   :  { %v1474_v32 = vld [vmem:[#allocation3] sm:$0xff]  ;;  %v1485_v52 = vpack.c.bf16 %v1481_v51, %v1480_v24 }
0x10f8   :  { %v1482_v36 = vpack.c.bf16 %v1475_v45, %v1474_v32 }
0x10fa   :  { %1783 = vmatprep.mubr.msk.bf16.mxu1 %vm435_vm12, %v1482_v36  ;;  %v1479_v50 = vld [vmem:[#allocation3 + $0x28] sm:$0xff] }
0x10fb   :  { %v1476_v47 = vld [vmem:[#allocation3 + $0x10] sm:$0xff]  ;;  %v1484_v38 = vpack.c.bf16 %v1479_v50, %v1478_v49 }
0x10fc   :  { %v1483_v48 = vpack.c.bf16 %v1477_v46, %v1476_v47 }
0x10fe   :  { %1784 = vmatmul.mubr.msk.bf16.vlgmr.msra.gmra.mrb[28].mxu1 %vm435_vm12, %v1483_v48 }
0x10ff   :  { %1787 = vmatprep.mubr.msk.bf16.mxu1 %vm435_vm12, %v1484_v38 }
0x1106   :  { %1788 = vmatmul.mubr.msk.bf16.gmra.mrb[32].mxu1 %vm435_vm12, %v1485_v52 }
0x11d1   :  { %v1785_v29 = vpop.f32.mrb[28].mxu1 }
0x11d2   :  { %v1580_v55 = vadd.f32 %v1785_v29, %v1743_v54  ;;  %v1571_v56 = vpop.f32.mrb[29].mxu1 }
0x11d3   :  { %v1572_v2 = vadd.f32 %v1743_v54, %v1571_v56  ;;  %v1786_v1 = vpop.f32.mrb[30].mxu1 }
0x11d4   :  { %1604 = vst [vmem:[#allocation9 + $0x10] sm:$0xff] %v1580_v55  ;;  %v1583_v4 = vadd.f32 %v1786_v1, %v1743_v54  ;;  %v1574_v6 = vpop.f32.mrb[31].mxu1 }
0x11d5   :  { %1602 = vst [vmem:[#allocation9] sm:$0xff] %v1572_v2  ;;  %v1575_v61 = vadd.f32 %v1743_v54, %v1574_v6 }
0x11d6   :  { %1605 = vst [vmem:[#allocation9 + $0x18] sm:$0xff] %v1583_v4 }
0x11d7   :  { %1603 = vst [vmem:[#allocation9 + $0x8] sm:$0xff] %v1575_v61 }
0x11d9   :  { %v1789_v7 = vpop.f32.mrb[32].mxu1 }
0x11da   :  { %v1596_v53 = vadd.f32 %v1789_v7, %v1743_v54  ;;  %v1587_v8 = vpop.f32.mrb[33].mxu1 }
0x11db   :  { %v1588_v9 = vadd.f32 %v1743_v54, %v1587_v8  ;;  %v1790_v60 = vpop.f32.mrb[34].mxu1 }
0x11dc   :  { %1608 = vst [vmem:[#allocation9 + $0x30] sm:$0xff] %v1596_v53  ;;  %v1599_v10 = vadd.f32 %v1790_v60, %v1743_v54  ;;  %v1590_v11 = vpop.f32.mrb[35].mxu1 }
0x11dd   :  { %1606 = vst [vmem:[#allocation9 + $0x20] sm:$0xff] %v1588_v9  ;;  %v1591_v14 = vadd.f32 %v1743_v54, %v1590_v11 }
0x11de   :  { %1609 = vst [vmem:[#allocation9 + $0x38] sm:$0xff] %v1599_v10 }
0x11df   :  { %1607 = vst [vmem:[#allocation9 + $0x28] sm:$0xff] %v1591_v14 }
0x11e0   :  { %1976 = shalt.err (!%p1973_p6)
}
0x11e1   :  { %s1977_s21 = scalar_lea.hbm %s2429_s7, 1024 }
0x11e2   :  { %p1978_p7 = scmp.ne.s32.totalorder %s2429_s7, %s1977_s21  ;;  %p1981_p8 = scmp.lt.u32.totalorder %s1977_s21, %s2429_s7 }
0x11e4   :  { %p1983_p9 = pnand %p1981_p8, %p1978_p7 }
0x11e6   :  { %1986 = shalt.err (!%p1983_p9)
}
0x11e7   :  { %1621 = dma.vmem_to_hbm [thread:$0]  %s1616_s18, 1024, %s2429_s7, [#allocation6], %s1994_s11, %s1994_s11, %s1995_s12  }
0x11e8   :  { %1991 = dma.done.wait [#allocation6], 1024  }
0x11e9   :  { %1992 = vsyncadd [#allocation6], 4294966272 }
0x11ea   :  { %1625 = vsyncpa [#allocation5], 1 }
0x11eb   :  { %1626 = vsyncpa [#allocation8], 1 }
0x11ec   :  { %1627 = vsyncpa [#allocation6], 1 }

</bundles_post_ra>
